<compile_context>
chip_gen: v7x
topology: tpu7x:2x2x1
jax: 0.10.0
libtpu: 0.0.40
codegen_flags: <defaults>
</compile_context>

<pallas_src>
import jax
import jax.numpy as jnp
from jax import lax
from jax.experimental import pallas as pl
from jax.experimental.pallas import tpu as pltpu

LANES = 128  # lane-dense output width (full vreg lane count)


def _fold_bn(w, b, bn, eps=1e-5):
    """Fold eval-mode BatchNorm into a conv weight ([..., Cout]) and bias ([Cout])."""
    s = bn["gamma"] * jax.lax.rsqrt(bn["var"] + eps)
    return w * s, (b - bn["mean"]) * s + bn["beta"]


def _make_kernel(*, H, W, Wp, Cin, Chid, K1, RB, OFF, rows_h, skip_identity):
    rows_out = H * Wp
    nblk = rows_out // RB

    def body(xcol_ref, xc_ref, w1_ref, b1_ref, w2_ref, bout_ref, wsk_ref,
             out_ref, hpad_ref):
        # ---- zero only the scratch halo rows (interior is fully overwritten below) ----
        hpad_ref[pl.ds(0, OFF), :] = jnp.zeros((OFF, Chid), jnp.float32)
        tail = rows_h - OFF - rows_out
        hpad_ref[pl.ds(OFF + rows_out, tail), :] = jnp.zeros((tail, Chid), jnp.float32)

        # phantom-column mask, computed in-kernel.  RB is a multiple of Wp and row blocks
        # start at multiples of RB, so one mask serves every block.
        col = lax.broadcasted_iota(jnp.int32, (RB, Chid), 0) % Wp
        keep = col < W

        w1 = w1_ref[...]            # [K1, Chid]   bf16
        b1 = b1_ref[...]            # [1, Chid]    f32

        # ---- phase 1: conv1 (single im2col matmul) + bias + ReLU + mask -> hpad ----
        def phase1(i, carry):
            r0 = pl.multiple_of(i * RB, 8)
            xblk = xcol_ref[pl.ds(r0, RB), :]                        # [RB, K1] bf16
            acc1 = jnp.dot(xblk, w1, preferred_element_type=jnp.float32)
            h1 = jnp.maximum(acc1 + b1, 0.0)
            h1 = jnp.where(keep, h1, 0.0)
            hpad_ref[pl.ds(OFF + r0, RB), :] = h1                    # 8-aligned store
            return carry

        lax.fori_loop(0, nblk, phase1, 0)

        w2 = [w2_ref[k] for k in range(9)]      # 9 x [Chid, LANES] bf16
        bout = bout_ref[...]                    # [1, LANES] f32 (= b2 [+ b_skip], padded)
        wsk = None if skip_identity else wsk_ref[...]

        # ---- phase 2: conv2 (9 shifted slabs) + skip + ReLU -> lane-dense output ----
        def phase2(i, carry):
            r0 = pl.multiple_of(i * RB, 8)
            acc2 = None
            for k in range(9):
                dy, dx = k // 3, k % 3
                base = OFF - Wp - 1 + dy * Wp + dx   # dy-component 8-aligned (Wp % 8 == 0)
                slab = hpad_ref[pl.ds(r0 + base, RB), :].astype(jnp.bfloat16)
                d = jnp.dot(slab, w2[k], preferred_element_type=jnp.float32)
                acc2 = d if acc2 is None else acc2 + d
            if skip_identity:
                ident = xc_ref[pl.ds(r0, RB), :]                     # [RB, LANES] f32, exact
            else:
                xcb = xc_ref[pl.ds(r0, RB), :]                       # [RB, Cin] bf16
                ident = jnp.dot(xcb, wsk, preferred_element_type=jnp.float32)
            out_ref[pl.ds(r0, RB), :] = jnp.maximum(acc2 + bout + ident, 0.0)
            return carry

        lax.fori_loop(0, nblk, phase2, 0)

    if skip_identity:
        def kernel(xcol_ref, xc_ref, w1_ref, b1_ref, w2_ref, bout_ref, out_ref, hpad_ref):
            body(xcol_ref, xc_ref, w1_ref, b1_ref, w2_ref, bout_ref, None,
                 out_ref, hpad_ref)
        return kernel
    return body


def enhanced_expert(x_nchw, params):
    """Forward pass of EnhancedExpert (eval mode). x_nchw: [B, Cin, H, W] -> [B, Cin, H, W]."""
    B, Cin, H, W = x_nchw.shape
    Chid = params["conv1_w"].shape[-1]
    skip_identity = "skip_w" not in params
    assert Cin <= LANES and Chid <= LANES

    # ---- geometry (multiples of 8 so stores / dy-tap reads stay sublane-aligned) ----
    Wp = ((W + 2 + 7) // 8) * 8                        # padded row width (>= W + 2 halo)
    rows_out = H * Wp                                  # flattened (H, Wp) output rows
    K1 = 9 * Cin                                       # im2col width for conv1
    OFF = ((Wp + 1 + 7) // 8) * 8                      # hpad interior start (multiple of 8)
    rows_h = ((OFF + rows_out + Wp + 1 + 7) // 8) * 8  # hpad scratch rows

    # row-block size: multiple of Wp (mask reuse), <=128 rows (bounds vreg live ranges),
    # and preferably a multiple of 16 rows (bf16 sublane packing of the xcol loads).
    cands = [c for c in range(1, H + 1) if H % c == 0 and c * Wp <= 128]
    aligned = [c for c in cands if (c * Wp) % 16 == 0]
    rpb = max(aligned) if aligned else (max(cands) if cands else 1)
    RB = rpb * Wp

    # ---- fold eval-mode BN into conv weights / biases; cast MXU operands to bf16 ----
    w1, b1 = _fold_bn(params["conv1_w"], params["conv1_b"], params["bn1"])
    w2, b2 = _fold_bn(params["conv2_w"], params["conv2_b"], params["bn2"])
    w1 = w1.reshape(K1, Chid).astype(jnp.bfloat16)              # rows: (dy*3+dx)*Cin + cin
    b1 = b1.reshape(1, Chid).astype(jnp.float32)
    w2 = jnp.pad(w2.reshape(9, Chid, Cin),                      # lane-dense output channels
                 ((0, 0), (0, 0), (0, LANES - Cin))).astype(jnp.bfloat16)
    bout = b2
    wsk = None
    if not skip_identity:
        wsk, bsk = _fold_bn(params["skip_w"], params["skip_b"], params["bn_skip"])
        wsk = jnp.pad(wsk, ((0, 0), (0, LANES - Cin))).astype(jnp.bfloat16)
        bout = bout + bsk                                       # conv2 + skip bias, pre-summed
    bout = jnp.pad(bout.reshape(1, Cin), ((0, 0), (0, LANES - Cin))).astype(jnp.float32)

    # ---- single fused host layout pass: zero halo, channels-last, im2col for conv1 ----
    # (If experts are chained, keep this flattened channels-last layout across calls
    #  instead of converting NCHW <-> channels-last per expert.)
    x_nhwc = jnp.transpose(x_nchw, (0, 2, 3, 1))                        # [B, H, W, C]
    xp = jnp.pad(x_nhwc, ((0, 0), (1, 1), (1, Wp + 1 - W), (0, 0)))     # [B, H+2, Wp+2, C]
    taps = [xp[:, dy:dy + H, dx:dx + Wp, :] for dy in range(3) for dx in range(3)]
    xcol = jnp.concatenate(taps, axis=-1).reshape(B, rows_out, K1).astype(jnp.bfloat16)
    xc = xp[:, 1:1 + H, 1:1 + Wp, :].reshape(B, rows_out, Cin)          # center tap
    if skip_identity:   # exact f32 residual, pre-padded to the lane-dense output width
        xc = jnp.pad(xc, ((0, 0), (0, 0), (0, LANES - Cin))).astype(jnp.float32)
    else:               # 1x1-conv skip: bf16 operand for the in-kernel matmul
        xc = xc.astype(jnp.bfloat16)

    kernel = _make_kernel(H=H, W=W, Wp=Wp, Cin=Cin, Chid=Chid, K1=K1, RB=RB,
                          OFF=OFF, rows_h=rows_h, skip_identity=skip_identity)

    in_specs = [
        pl.BlockSpec((None, rows_out, K1), lambda b: (b, 0, 0)),           # im2col input
        pl.BlockSpec((None, rows_out, xc.shape[-1]), lambda b: (b, 0, 0)), # center slab
        pl.BlockSpec((K1, Chid), lambda b: (0, 0)),                        # conv1 (folded)
        pl.BlockSpec((1, Chid), lambda b: (0, 0)),
        pl.BlockSpec((9, Chid, LANES), lambda b: (0, 0, 0)),               # conv2 (folded, padded)
        pl.BlockSpec((1, LANES), lambda b: (0, 0)),
    ]
    args = [xcol, xc, w1, b1, w2, bout]
    if not skip_identity:
        in_specs.append(pl.BlockSpec((Cin, LANES), lambda b: (0, 0)))      # skip 1x1 (folded)
        args.append(wsk)

    out = pl.pallas_call(
        kernel,
        out_shape=jax.ShapeDtypeStruct((B, rows_out, LANES), jnp.float32),
        grid=(B,),
        in_specs=in_specs,
        out_specs=pl.BlockSpec((None, rows_out, LANES), lambda b: (b, 0, 0)),
        scratch_shapes=[pltpu.VMEM((rows_h, Chid), jnp.float32)],
        compiler_params=pltpu.CompilerParams(
            dimension_semantics=("parallel",),
            vmem_limit_bytes=32 * 1024 * 1024),
    )(*args)

    # drop phantom columns / padded lanes and return to NCHW
    y = out.reshape(B, H, Wp, LANES)[:, :, :W, :Cin]
    return jnp.transpose(y, (0, 3, 1, 2))


# ------------------------- pure-JAX reference (independent check) -------------------------

def reference(x, params, eps=1e-5):
    def bn(z, p):
        return ((z - p["mean"][None, :, None, None])
                * jax.lax.rsqrt(p["var"][None, :, None, None] + eps)
                * p["gamma"][None, :, None, None]
                + p["beta"][None, :, None, None])

    def conv3x3(z, w_hwio, b):
        w_oihw = jnp.transpose(w_hwio, (3, 2, 0, 1))
        y = jax.lax.conv_general_dilated(z, w_oihw, (1, 1), ((1, 1), (1, 1)),
                                         dimension_numbers=("NCHW", "OIHW", "NCHW"))
        return y + b[None, :, None, None]

    if "skip_w" in params:
        w_oihw = jnp.transpose(params["skip_w"], (1, 0))[:, :, None, None]
        idn = jax.lax.conv_general_dilated(x, w_oihw, (1, 1), ((0, 0), (0, 0)),
                                           dimension_numbers=("NCHW", "OIHW", "NCHW"))
        idn = bn(idn + params["skip_b"][None, :, None, None], params["bn_skip"])
    else:
        idn = x

    out = jax.nn.relu(bn(conv3x3(x, params["conv1_w"], params["conv1_b"]), params["bn1"]))
    out = bn(conv3x3(out, params["conv2_w"], params["conv2_b"]), params["bn2"])
    return jax.nn.relu(out + idn)


def init_params(key, in_dim, hidden_dim):
    ks = jax.random.split(key, 8)

    def conv_w(k, kh, kw, ci, co):
        bound = 1.0 / jnp.sqrt(float(ci * kh * kw))
        return jax.random.uniform(k, (kh, kw, ci, co), jnp.float32, -bound, bound)

    def bn_params(k, c):
        k1, k2, k3, k4 = jax.random.split(k, 4)
        return {
            "gamma": jax.random.uniform(k1, (c,), jnp.float32, 0.5, 1.5),
            "beta": 0.1 * jax.random.normal(k2, (c,), jnp.float32),
            "mean": 0.1 * jax.random.normal(k3, (c,), jnp.float32),
            "var": jax.random.uniform(k4, (c,), jnp.float32, 0.5, 1.5),
        }

    p = {
        "conv1_w": conv_w(ks[0], 3, 3, in_dim, hidden_dim),
        "conv1_b": 0.1 * jax.random.normal(ks[1], (hidden_dim,), jnp.float32),
        "bn1": bn_params(ks[2], hidden_dim),
        "conv2_w": conv_w(ks[3], 3, 3, hidden_dim, in_dim),
        "conv2_b": jnp.zeros((in_dim,), jnp.float32),     # zeros_ init in the module
        "bn2": bn_params(ks[4], in_dim),
    }
    if in_dim != hidden_dim:
        p["skip_w"] = conv_w(ks[5], 1, 1, in_dim, in_dim)[0, 0]       # [Cin, Cin]
        p["skip_b"] = jnp.zeros((in_dim,), jnp.float32)
        p["bn_skip"] = bn_params(ks[6], in_dim)
    return p


if __name__ == "__main__":
    B, H, W = 2, 16, 16
    key = jax.random.PRNGKey(0)

    fwd = jax.jit(enhanced_expert)

    # exercise both skip paths: conv-skip (in_dim != hidden_dim) and Identity skip
    for in_dim, hidden_dim in [(4, 8), (8, 8)]:
        kx, kp, key = jax.random.split(key, 3)
        x = jax.random.normal(kx, (B, in_dim, H, W), jnp.float32)
        params = init_params(kp, in_dim, hidden_dim)

        out = jax.block_until_ready(fwd(x, params))
        ref = jax.block_until_ready(reference(x, params))

        assert out.shape == (B, in_dim, H, W)
        assert bool(jnp.all(out >= 0.0))
        max_err = float(jnp.max(jnp.abs(out - ref)))
        # bf16 MXU operands (per perf review) -> validate at a bf16-level tolerance
        assert jnp.allclose(out, ref, atol=4e-2, rtol=2e-2), max_err

    print("KERNEL_OK")
</pallas_src>

<mosaic_0001>
module attributes {stable_mosaic.version = 11 : i64} {
  func.func @body(%arg0: i32, %arg1: memref<1x384x36xbf16, #tpu.memory_space<vmem>>, %arg2: memref<1x384x4xbf16, #tpu.memory_space<vmem>>, %arg3: memref<36x8xbf16, #tpu.memory_space<vmem>>, %arg4: memref<1x8xf32, #tpu.memory_space<vmem>>, %arg5: memref<9x8x128xbf16, #tpu.memory_space<vmem>>, %arg6: memref<1x128xf32, #tpu.memory_space<vmem>>, %arg7: memref<4x128xbf16, #tpu.memory_space<vmem>>, %arg8: memref<1x384x128xf32, #tpu.memory_space<vmem>>, %arg9: memref<448x8xf32, #tpu.memory_space<vmem>>) attributes {dimension_semantics = [#tpu.dimension_semantics<parallel>], iteration_bounds = array<i64: 2>, scalar_prefetch = 0 : i64, scratch_operands = 1 : i64, tpu.core_type = #tpu.core_type<tc>, window_params = [{transform_indices = @transform_0, window_bounds = array<i64: 1, 384, 36>}, {transform_indices = @transform_1, window_bounds = array<i64: 1, 384, 4>}, {pipeline_mode = #tpu.pipeline_mode<synchronous>, transform_indices = @transform_2, window_bounds = array<i64: 36, 8>}, {pipeline_mode = #tpu.pipeline_mode<synchronous>, transform_indices = @transform_3, window_bounds = array<i64: 1, 8>}, {pipeline_mode = #tpu.pipeline_mode<synchronous>, transform_indices = @transform_4, window_bounds = array<i64: 9, 8, 128>}, {pipeline_mode = #tpu.pipeline_mode<synchronous>, transform_indices = @transform_5, window_bounds = array<i64: 1, 128>}, {pipeline_mode = #tpu.pipeline_mode<synchronous>, transform_indices = @transform_6, window_bounds = array<i64: 4, 128>}, {transform_indices = @transform_7, window_bounds = array<i64: 1, 384, 128>}]} {
    %cst = arith.constant 0.000000e+00 : f32
    %0 = vector.broadcast %cst : f32 to vector<32x8xf32>
    %c0 = arith.constant 0 : index
    %c0_0 = arith.constant 0 : index
    %1 = vector.load %arg9[%c0, %c0_0] : memref<448x8xf32, #tpu.memory_space<vmem>>, vector<32x8xf32>
    tpu.vector_store %arg9[%c0, %c0_0], %0 {strides = array<i32>} : memref<448x8xf32, #tpu.memory_space<vmem>>, vector<32x8xf32>,
    %cst_1 = arith.constant 0.000000e+00 : f32
    %2 = vector.broadcast %cst_1 : f32 to vector<32x8xf32>
    %c416 = arith.constant 416 : index
    %c0_2 = arith.constant 0 : index
    %3 = vector.load %arg9[%c416, %c0_2] : memref<448x8xf32, #tpu.memory_space<vmem>>, vector<32x8xf32>
    tpu.vector_store %arg9[%c416, %c0_2], %2 {strides = array<i32>} : memref<448x8xf32, #tpu.memory_space<vmem>>, vector<32x8xf32>,
    %4 = tpu.iota {dimensions = array<i32: 0>} : vector<96x8xi32>
    %c24_i32 = arith.constant 24 : i32
    %c0_i32 = arith.constant 0 : i32
    %5 = arith.cmpi eq, %c24_i32, %c0_i32 : i32
    %c1_i32 = arith.constant 1 : i32
    %6 = arith.select %5, %c1_i32, %c24_i32 : i32
    %7 = vector.broadcast %6 : i32 to vector<96x8xi32>
    %8 = arith.remsi %4, %7 : vector<96x8xi32>
    %c0_i32_3 = arith.constant 0 : i32
    %9 = vector.broadcast %c0_i32_3 : i32 to vector<96x8xi32>
    %10 = arith.cmpi ne, %8, %9 : vector<96x8xi32>
    %c0_i32_4 = arith.constant 0 : i32
    %11 = vector.broadcast %c0_i32_4 : i32 to vector<96x8xi32>
    %12 = arith.cmpi slt, %8, %11 : vector<96x8xi32>
    %c0_i32_5 = arith.constant 0 : i32
    %13 = arith.cmpi slt, %6, %c0_i32_5 : i32
    %14 = vector.broadcast %13 : i1 to vector<96x8xi1>
    %15 = vector.broadcast %14 : vector<96x8xi1> to vector<96x8xi1>
    %16 = arith.xori %12, %15 : vector<96x8xi1>
    %17 = arith.andi %16, %10 : vector<96x8xi1>
    %18 = vector.broadcast %6 : i32 to vector<96x8xi32>
    %19 = arith.addi %8, %18 : vector<96x8xi32>
    %20 = arith.select %17, %19, %8 : vector<96x8xi1>, vector<96x8xi32>
    %c16_i32 = arith.constant 16 : i32
    %21 = vector.broadcast %c16_i32 : i32 to vector<96x8xi32>
    %22 = arith.cmpi slt, %20, %21 : vector<96x8xi32>
    %c0_6 = arith.constant 0 : index
    %c0_7 = arith.constant 0 : index
    %23 = vector.load %arg3[%c0_6, %c0_7] : memref<36x8xbf16, #tpu.memory_space<vmem>>, vector<36x8xbf16>
    %c0_8 = arith.constant 0 : index
    %c0_9 = arith.constant 0 : index
    %24 = vector.load %arg4[%c0_8, %c0_9] : memref<1x8xf32, #tpu.memory_space<vmem>>, vector<1x8xf32>
    %c0_i32_10 = arith.constant 0 : i32
    %c4_i32 = arith.constant 4 : i32
    %25 = arith.addi %c0_i32_10, %c4_i32 : i32
    %c1_i32_11 = arith.constant 1 : i32
    scf.for %arg10 = %c0_i32_10 to %25 step %c1_i32_11  : i32 {
      %c96_i32 = arith.constant 96 : i32
      %47 = arith.muli %arg10, %c96_i32 : i32
      %48 = tpu.assume_multiple %47, 8 : i32
      %c0_40 = arith.constant 0 : index
      %49 = arith.index_cast %48 : i32 to index
      %c0_41 = arith.constant 0 : index
      %50 = vector.load %arg1[%c0_40, %49, %c0_41] : memref<1x384x36xbf16, #tpu.memory_space<vmem>>, vector<1x96x36xbf16>
      %51 = vector.shape_cast %50 : vector<1x96x36xbf16> to vector<96x36xbf16>
      %cst_42 = arith.constant dense<0.000000e+00> : vector<96x8xf32>
      %52 = tpu.matmul %51, %23, %cst_42 {dimension_numbers = #tpu.dot_dimension_numbers<[1], [0], [0], [1], [0, 0, 1, 1], [], []>} : vector<96x36xbf16>, vector<36x8xbf16>, vector<96x8xf32> -> vector<96x8xf32>
      %53 = vector.broadcast %24 : vector<1x8xf32> to vector<96x8xf32>
      %54 = arith.addf %52, %53 : vector<96x8xf32>
      %cst_43 = arith.constant 0.000000e+00 : f32
      %55 = vector.broadcast %cst_43 : f32 to vector<96x8xf32>
      %56 = arith.maximumf %54, %55 : vector<96x8xf32>
      %cst_44 = arith.constant 0.000000e+00 : f32
      %57 = vector.broadcast %cst_44 : f32 to vector<96x8xf32>
      %58 = arith.select %22, %56, %57 : vector<96x8xi1>, vector<96x8xf32>
      %c32_i32 = arith.constant 32 : i32
      %59 = arith.addi %c32_i32, %48 : i32
      %60 = arith.index_cast %59 : i32 to index
      %c0_45 = arith.constant 0 : index
      %61 = vector.load %arg9[%60, %c0_45] : memref<448x8xf32, #tpu.memory_space<vmem>>, vector<96x8xf32>
      tpu.vector_store %arg9[%60, %c0_45], %58 {strides = array<i32>} : memref<448x8xf32, #tpu.memory_space<vmem>>, vector<96x8xf32>,
    }
    %c4_i32_12 = arith.constant 4 : i32
    %c0_13 = arith.constant 0 : index
    %c0_14 = arith.constant 0 : index
    %c0_15 = arith.constant 0 : index
    %26 = vector.load %arg5[%c0_13, %c0_14, %c0_15] : memref<9x8x128xbf16, #tpu.memory_space<vmem>>, vector<1x8x128xbf16>
    %27 = vector.shape_cast %26 : vector<1x8x128xbf16> to vector<8x128xbf16>
    %c1 = arith.constant 1 : index
    %c0_16 = arith.constant 0 : index
    %c0_17 = arith.constant 0 : index
    %28 = vector.load %arg5[%c1, %c0_16, %c0_17] : memref<9x8x128xbf16, #tpu.memory_space<vmem>>, vector<1x8x128xbf16>
    %29 = vector.shape_cast %28 : vector<1x8x128xbf16> to vector<8x128xbf16>
    %c2 = arith.constant 2 : index
    %c0_18 = arith.constant 0 : index
    %c0_19 = arith.constant 0 : index
    %30 = vector.load %arg5[%c2, %c0_18, %c0_19] : memref<9x8x128xbf16, #tpu.memory_space<vmem>>, vector<1x8x128xbf16>
    %31 = vector.shape_cast %30 : vector<1x8x128xbf16> to vector<8x128xbf16>
    %c3 = arith.constant 3 : index
    %c0_20 = arith.constant 0 : index
    %c0_21 = arith.constant 0 : index
    %32 = vector.load %arg5[%c3, %c0_20, %c0_21] : memref<9x8x128xbf16, #tpu.memory_space<vmem>>, vector<1x8x128xbf16>
    %33 = vector.shape_cast %32 : vector<1x8x128xbf16> to vector<8x128xbf16>
    %c4 = arith.constant 4 : index
    %c0_22 = arith.constant 0 : index
    %c0_23 = arith.constant 0 : index
    %34 = vector.load %arg5[%c4, %c0_22, %c0_23] : memref<9x8x128xbf16, #tpu.memory_space<vmem>>, vector<1x8x128xbf16>
    %35 = vector.shape_cast %34 : vector<1x8x128xbf16> to vector<8x128xbf16>
    %c5 = arith.constant 5 : index
    %c0_24 = arith.constant 0 : index
    %c0_25 = arith.constant 0 : index
    %36 = vector.load %arg5[%c5, %c0_24, %c0_25] : memref<9x8x128xbf16, #tpu.memory_space<vmem>>, vector<1x8x128xbf16>
    %37 = vector.shape_cast %36 : vector<1x8x128xbf16> to vector<8x128xbf16>
    %c6 = arith.constant 6 : index
    %c0_26 = arith.constant 0 : index
    %c0_27 = arith.constant 0 : index
    %38 = vector.load %arg5[%c6, %c0_26, %c0_27] : memref<9x8x128xbf16, #tpu.memory_space<vmem>>, vector<1x8x128xbf16>
    %39 = vector.shape_cast %38 : vector<1x8x128xbf16> to vector<8x128xbf16>
    %c7 = arith.constant 7 : index
    %c0_28 = arith.constant 0 : index
    %c0_29 = arith.constant 0 : index
    %40 = vector.load %arg5[%c7, %c0_28, %c0_29] : memref<9x8x128xbf16, #tpu.memory_space<vmem>>, vector<1x8x128xbf16>
    %41 = vector.shape_cast %40 : vector<1x8x128xbf16> to vector<8x128xbf16>
    %c8 = arith.constant 8 : index
    %c0_30 = arith.constant 0 : index
    %c0_31 = arith.constant 0 : index
    %42 = vector.load %arg5[%c8, %c0_30, %c0_31] : memref<9x8x128xbf16, #tpu.memory_space<vmem>>, vector<1x8x128xbf16>
    %43 = vector.shape_cast %42 : vector<1x8x128xbf16> to vector<8x128xbf16>
    %c0_32 = arith.constant 0 : index
    %c0_33 = arith.constant 0 : index
    %44 = vector.load %arg6[%c0_32, %c0_33] : memref<1x128xf32, #tpu.memory_space<vmem>>, vector<1x128xf32>
    %c0_34 = arith.constant 0 : index
    %c0_35 = arith.constant 0 : index
    %45 = vector.load %arg7[%c0_34, %c0_35] : memref<4x128xbf16, #tpu.memory_space<vmem>>, vector<4x128xbf16>
    %c0_i32_36 = arith.constant 0 : i32
    %c4_i32_37 = arith.constant 4 : i32
    %46 = arith.addi %c0_i32_36, %c4_i32_37 : i32
    %c1_i32_38 = arith.constant 1 : i32
    scf.for %arg10 = %c0_i32_36 to %46 step %c1_i32_38  : i32 {
      %c96_i32 = arith.constant 96 : i32
      %47 = arith.muli %arg10, %c96_i32 : i32
      %48 = tpu.assume_multiple %47, 8 : i32
      %c7_i32 = arith.constant 7 : i32
      %49 = arith.addi %48, %c7_i32 : i32
      %50 = arith.index_cast %49 : i32 to index
      %c0_40 = arith.constant 0 : index
      %51 = vector.load %arg9[%50, %c0_40] : memref<448x8xf32, #tpu.memory_space<vmem>>, vector<96x8xf32>
      %52 = arith.truncf %51 : vector<96x8xf32> to vector<96x8xbf16>
      %cst_41 = arith.constant dense<0.000000e+00> : vector<96x128xf32>
      %53 = tpu.matmul %52, %27, %cst_41 {dimension_numbers = #tpu.dot_dimension_numbers<[1], [0], [0], [1], [0, 0, 1, 1], [], []>} : vector<96x8xbf16>, vector<8x128xbf16>, vector<96x128xf32> -> vector<96x128xf32>
      %c8_i32 = arith.constant 8 : i32
      %54 = arith.addi %48, %c8_i32 : i32
      %55 = arith.index_cast %54 : i32 to index
      %c0_42 = arith.constant 0 : index
      %56 = vector.load %arg9[%55, %c0_42] : memref<448x8xf32, #tpu.memory_space<vmem>>, vector<96x8xf32>
      %57 = arith.truncf %56 : vector<96x8xf32> to vector<96x8xbf16>
      %cst_43 = arith.constant dense<0.000000e+00> : vector<96x128xf32>
      %58 = tpu.matmul %57, %29, %cst_43 {dimension_numbers = #tpu.dot_dimension_numbers<[1], [0], [0], [1], [0, 0, 1, 1], [], []>} : vector<96x8xbf16>, vector<8x128xbf16>, vector<96x128xf32> -> vector<96x128xf32>
      %59 = arith.addf %53, %58 : vector<96x128xf32>
      %c9_i32 = arith.constant 9 : i32
      %60 = arith.addi %48, %c9_i32 : i32
      %61 = arith.index_cast %60 : i32 to index
      %c0_44 = arith.constant 0 : index
      %62 = vector.load %arg9[%61, %c0_44] : memref<448x8xf32, #tpu.memory_space<vmem>>, vector<96x8xf32>
      %63 = arith.truncf %62 : vector<96x8xf32> to vector<96x8xbf16>
      %cst_45 = arith.constant dense<0.000000e+00> : vector<96x128xf32>
      %64 = tpu.matmul %63, %31, %cst_45 {dimension_numbers = #tpu.dot_dimension_numbers<[1], [0], [0], [1], [0, 0, 1, 1], [], []>} : vector<96x8xbf16>, vector<8x128xbf16>, vector<96x128xf32> -> vector<96x128xf32>
      %65 = arith.addf %59, %64 : vector<96x128xf32>
      %c31_i32 = arith.constant 31 : i32
      %66 = arith.addi %48, %c31_i32 : i32
      %67 = arith.index_cast %66 : i32 to index
      %c0_46 = arith.constant 0 : index
      %68 = vector.load %arg9[%67, %c0_46] : memref<448x8xf32, #tpu.memory_space<vmem>>, vector<96x8xf32>
      %69 = arith.truncf %68 : vector<96x8xf32> to vector<96x8xbf16>
      %cst_47 = arith.constant dense<0.000000e+00> : vector<96x128xf32>
      %70 = tpu.matmul %69, %33, %cst_47 {dimension_numbers = #tpu.dot_dimension_numbers<[1], [0], [0], [1], [0, 0, 1, 1], [], []>} : vector<96x8xbf16>, vector<8x128xbf16>, vector<96x128xf32> -> vector<96x128xf32>
      %71 = arith.addf %65, %70 : vector<96x128xf32>
      %c32_i32 = arith.constant 32 : i32
      %72 = arith.addi %48, %c32_i32 : i32
      %73 = arith.index_cast %72 : i32 to index
      %c0_48 = arith.constant 0 : index
      %74 = vector.load %arg9[%73, %c0_48] : memref<448x8xf32, #tpu.memory_space<vmem>>, vector<96x8xf32>
      %75 = arith.truncf %74 : vector<96x8xf32> to vector<96x8xbf16>
      %cst_49 = arith.constant dense<0.000000e+00> : vector<96x128xf32>
      %76 = tpu.matmul %75, %35, %cst_49 {dimension_numbers = #tpu.dot_dimension_numbers<[1], [0], [0], [1], [0, 0, 1, 1], [], []>} : vector<96x8xbf16>, vector<8x128xbf16>, vector<96x128xf32> -> vector<96x128xf32>
      %77 = arith.addf %71, %76 : vector<96x128xf32>
      %c33_i32 = arith.constant 33 : i32
      %78 = arith.addi %48, %c33_i32 : i32
      %79 = arith.index_cast %78 : i32 to index
      %c0_50 = arith.constant 0 : index
      %80 = vector.load %arg9[%79, %c0_50] : memref<448x8xf32, #tpu.memory_space<vmem>>, vector<96x8xf32>
      %81 = arith.truncf %80 : vector<96x8xf32> to vector<96x8xbf16>
      %cst_51 = arith.constant dense<0.000000e+00> : vector<96x128xf32>
      %82 = tpu.matmul %81, %37, %cst_51 {dimension_numbers = #tpu.dot_dimension_numbers<[1], [0], [0], [1], [0, 0, 1, 1], [], []>} : vector<96x8xbf16>, vector<8x128xbf16>, vector<96x128xf32> -> vector<96x128xf32>
      %83 = arith.addf %77, %82 : vector<96x128xf32>
      %c55_i32 = arith.constant 55 : i32
      %84 = arith.addi %48, %c55_i32 : i32
      %85 = arith.index_cast %84 : i32 to index
      %c0_52 = arith.constant 0 : index
      %86 = vector.load %arg9[%85, %c0_52] : memref<448x8xf32, #tpu.memory_space<vmem>>, vector<96x8xf32>
      %87 = arith.truncf %86 : vector<96x8xf32> to vector<96x8xbf16>
      %cst_53 = arith.constant dense<0.000000e+00> : vector<96x128xf32>
      %88 = tpu.matmul %87, %39, %cst_53 {dimension_numbers = #tpu.dot_dimension_numbers<[1], [0], [0], [1], [0, 0, 1, 1], [], []>} : vector<96x8xbf16>, vector<8x128xbf16>, vector<96x128xf32> -> vector<96x128xf32>
      %89 = arith.addf %83, %88 : vector<96x128xf32>
      %c56_i32 = arith.constant 56 : i32
      %90 = arith.addi %48, %c56_i32 : i32
      %91 = arith.index_cast %90 : i32 to index
      %c0_54 = arith.constant 0 : index
      %92 = vector.load %arg9[%91, %c0_54] : memref<448x8xf32, #tpu.memory_space<vmem>>, vector<96x8xf32>
      %93 = arith.truncf %92 : vector<96x8xf32> to vector<96x8xbf16>
      %cst_55 = arith.constant dense<0.000000e+00> : vector<96x128xf32>
      %94 = tpu.matmul %93, %41, %cst_55 {dimension_numbers = #tpu.dot_dimension_numbers<[1], [0], [0], [1], [0, 0, 1, 1], [], []>} : vector<96x8xbf16>, vector<8x128xbf16>, vector<96x128xf32> -> vector<96x128xf32>
      %95 = arith.addf %89, %94 : vector<96x128xf32>
      %c57_i32 = arith.constant 57 : i32
      %96 = arith.addi %48, %c57_i32 : i32
      %97 = arith.index_cast %96 : i32 to index
      %c0_56 = arith.constant 0 : index
      %98 = vector.load %arg9[%97, %c0_56] : memref<448x8xf32, #tpu.memory_space<vmem>>, vector<96x8xf32>
      %99 = arith.truncf %98 : vector<96x8xf32> to vector<96x8xbf16>
      %cst_57 = arith.constant dense<0.000000e+00> : vector<96x128xf32>
      %100 = tpu.matmul %99, %43, %cst_57 {dimension_numbers = #tpu.dot_dimension_numbers<[1], [0], [0], [1], [0, 0, 1, 1], [], []>} : vector<96x8xbf16>, vector<8x128xbf16>, vector<96x128xf32> -> vector<96x128xf32>
      %101 = arith.addf %95, %100 : vector<96x128xf32>
      %c0_58 = arith.constant 0 : index
      %102 = arith.index_cast %48 : i32 to index
      %c0_59 = arith.constant 0 : index
      %103 = vector.load %arg2[%c0_58, %102, %c0_59] : memref<1x384x4xbf16, #tpu.memory_space<vmem>>, vector<1x96x4xbf16>
      %104 = vector.shape_cast %103 : vector<1x96x4xbf16> to vector<96x4xbf16>
      %cst_60 = arith.constant dense<0.000000e+00> : vector<96x128xf32>
      %105 = tpu.matmul %104, %45, %cst_60 {dimension_numbers = #tpu.dot_dimension_numbers<[1], [0], [0], [1], [0, 0, 1, 1], [], []>} : vector<96x4xbf16>, vector<4x128xbf16>, vector<96x128xf32> -> vector<96x128xf32>
      %106 = vector.broadcast %44 : vector<1x128xf32> to vector<96x128xf32>
      %107 = arith.addf %101, %106 : vector<96x128xf32>
      %108 = arith.addf %107, %105 : vector<96x128xf32>
      %cst_61 = arith.constant 0.000000e+00 : f32
      %109 = vector.broadcast %cst_61 : f32 to vector<96x128xf32>
      %110 = arith.maximumf %108, %109 : vector<96x128xf32>
      %c0_62 = arith.constant 0 : index
      %111 = arith.index_cast %48 : i32 to index
      %c0_63 = arith.constant 0 : index
      %112 = vector.load %arg8[%c0_62, %111, %c0_63] : memref<1x384x128xf32, #tpu.memory_space<vmem>>, vector<1x96x128xf32>
      %113 = vector.shape_cast %112 : vector<1x96x128xf32> to vector<96x128xf32>
      %114 = vector.shape_cast %110 : vector<96x128xf32> to vector<1x96x128xf32>
      tpu.vector_store %arg8[%c0_62, %111, %c0_63], %114 {strides = array<i32>} : memref<1x384x128xf32, #tpu.memory_space<vmem>>, vector<1x96x128xf32>,
    }
    %c4_i32_39 = arith.constant 4 : i32
    return
  }
  func.func @transform_0(%arg0: i32) -> (i32, i32, i32) {
    %c0_i32 = arith.constant 0 : i32
    %c0_i32_0 = arith.constant 0 : i32
    %c0_i32_1 = arith.constant 0 : i32
    return %arg0, %c0_i32, %c0_i32_0 : i32, i32, i32
  }
  func.func @transform_1(%arg0: i32) -> (i32, i32, i32) {
    %c0_i32 = arith.constant 0 : i32
    %c0_i32_0 = arith.constant 0 : i32
    %c0_i32_1 = arith.constant 0 : i32
    return %arg0, %c0_i32, %c0_i32_0 : i32, i32, i32
  }
  func.func @transform_2(%arg0: i32) -> (i32, i32) {
    %c0_i32 = arith.constant 0 : i32
    %c0_i32_0 = arith.constant 0 : i32
    %c0_i32_1 = arith.constant 0 : i32
    return %c0_i32, %c0_i32_0 : i32, i32
  }
  func.func @transform_3(%arg0: i32) -> (i32, i32) {
    %c0_i32 = arith.constant 0 : i32
    %c0_i32_0 = arith.constant 0 : i32
    %c0_i32_1 = arith.constant 0 : i32
    return %c0_i32, %c0_i32_0 : i32, i32
  }
  func.func @transform_4(%arg0: i32) -> (i32, i32, i32) {
    %c0_i32 = arith.constant 0 : i32
    %c0_i32_0 = arith.constant 0 : i32
    %c0_i32_1 = arith.constant 0 : i32
    %c0_i32_2 = arith.constant 0 : i32
    return %c0_i32, %c0_i32_0, %c0_i32_1 : i32, i32, i32
  }
  func.func @transform_5(%arg0: i32) -> (i32, i32) {
    %c0_i32 = arith.constant 0 : i32
    %c0_i32_0 = arith.constant 0 : i32
    %c0_i32_1 = arith.constant 0 : i32
    return %c0_i32, %c0_i32_0 : i32, i32
  }
  func.func @transform_6(%arg0: i32) -> (i32, i32) {
    %c0_i32 = arith.constant 0 : i32
    %c0_i32_0 = arith.constant 0 : i32
    %c0_i32_1 = arith.constant 0 : i32
    return %c0_i32, %c0_i32_0 : i32, i32
  }
  func.func @transform_7(%arg0: i32) -> (i32, i32, i32) {
    %c0_i32 = arith.constant 0 : i32
    %c0_i32_0 = arith.constant 0 : i32
    %c0_i32_1 = arith.constant 0 : i32
    return %arg0, %c0_i32, %c0_i32_0 : i32, i32, i32
  }
}

</mosaic_0001>

<bundles_post_ra>
// kernel: enhanced_expert.1
= control target key start
LH: loop header
LB: loop body
LE: loop exit
PB: predicated region body
PF: predicated region fallthrough
CT: control target
= control target key end

     0   :  { %s3001_s24 = smov 0   ;;  %s3860_s0 = inlined_call_operand.vmem [shape: bf16[2,384,36], index: 0, kind: input, shape index: {}]   ;;  %s3861_s1 = inlined_call_operand.vmem [shape: bf16[2,384,4], index: 1, kind: input, shape index: {}]   ;;  %s3862_s2 = inlined_call_operand.vmem [shape: bf16[36,8], index: 2, kind: input, shape index: {}]   ;;  %s3863_s3 = inlined_call_operand.vmem [shape: f32[1,8], index: 3, kind: input, shape index: {}]   ;;  %s3864_s4 = inlined_call_operand.vmem [shape: bf16[9,8,128], index: 4, kind: input, shape index: {}]   ;;  %s3865_s5 = inlined_call_operand.vmem [shape: f32[1,128], index: 5, kind: input, shape index: {}]   ;;  %s3866_s6 = inlined_call_operand.vmem [shape: bf16[4,128], index: 6, kind: input, shape index: {}]   ;;  %s3867_s7 = inlined_call_operand.vmem [shape: f32[2,384,128], index: 7, kind: output, shape index: {}]  }
   0x1 LB: > { %s2275_s25 = sadd.s32 4294967295, %s2950_s24   ;;  %p2279_p0 = scmp.ge.s32.totalorder %s2950_s24, 1  ;;  %s2950_s24 = sphi %s3001_s24, %s17_s24  }
   0x2   : > { %p247_p1 = scmp.lt.s32.totalorder %s2950_s24, 3 }
   0x4   : > { %p248_p2 = pnand %p2279_p0, %p247_p1 }
   0x5   : > { %p3009_p3 = scmp.lt.s32.totalorder (!%p248_p2), %s2275_s25, 1  ;;  %vm3868_vm0 = vcmask (!%p248_p2), 64512   ;;  %v309_v0 = vlaneseq (!%p248_p2)  ;;  %v3016_v1 = vld [vmem:[%s3862_s2] sm:$0xf] (!%p248_p2)  ;;  %v2960_v2 = vmov (!%p248_p2), 0.0   ;;  %s3332_s28 = smov (!%p248_p2), 0  }
   0x6   : > { %251 = sbr.rel (%p248_p2) target bundleno = 632 (0x278), region = 48  ;;  %301 = vst.msk [vmem:[#allocation2] sm:$0xff] (!%p248_p2), %vm3868_vm0, %v2960_v2  ;;  %302 = vst.msk [vmem:[#allocation2 + $0x8] sm:$0xff] (!%p248_p2), %vm3868_vm0, %v2960_v2  ;;  %v3029_v3 = vld [vmem:[%s3862_s2 + $0x4] sm:$0xf] (!%p248_p2) }
   0x7   : > { %303 = vst.msk [vmem:[#allocation2 + $0x10] sm:$0xff] (!%p248_p2), %vm3868_vm0, %v2960_v2  ;;  %304 = vst.msk [vmem:[#allocation2 + $0x18] sm:$0xff] (!%p248_p2), %vm3868_vm0, %v2960_v2  ;;  %v3034_v4 = vld [vmem:[%s3862_s2 + $0x8] sm:$0xf] (!%p248_p2)  ;;  %v3039_v5 = vld [vmem:[%s3862_s2 + $0xc] sm:$0xf] (!%p248_p2) }
   0x8   : > { %305 = vst.msk [vmem:[#allocation2 + $0x1a0] sm:$0xff] (!%p248_p2), %vm3868_vm0, %v2960_v2  ;;  %306 = vst.msk [vmem:[#allocation2 + $0x1a8] sm:$0xff] (!%p248_p2), %vm3868_vm0, %v2960_v2  ;;  %v310_v6 = vshrl.u32 (!%p248_p2), %v309_v0, 7  ;;  %v3046_v7 = vld [vmem:[%s3862_s2 + $0x10] sm:$0x3] (!%p248_p2) }
   0x9   : > { %307 = vst.msk [vmem:[#allocation2 + $0x1b0] sm:$0xff] (!%p248_p2), %vm3868_vm0, %v2960_v2  ;;  %308 = vst.msk [vmem:[#allocation2 + $0x1b8] sm:$0xff] (!%p248_p2), %vm3868_vm0, %v2960_v2  ;;  %v3051_v8 = vld [vmem:[%s3863_s3] ss:$0 sm:$0xff] (!%p248_p2) }
   0xa   : > { %v311_v9 = vadd.s32 (!%p248_p2), 8, %v310_v6  ;;  %v312_v10 = vadd.s32 (!%p248_p2), 16, %v310_v6  ;;  %v313_v11 = vadd.s32 (!%p248_p2), 24, %v310_v6  ;;  %v314_v12 = vadd.s32 (!%p248_p2), 32, %v310_v6 }
   0xb   : > { %v315_v13 = vadd.s32 (!%p248_p2), 40, %v310_v6  ;;  %v316_v14 = vadd.s32 (!%p248_p2), 48, %v310_v6  ;;  %v317_v15 = vadd.s32 (!%p248_p2), 56, %v310_v6  ;;  %v318_v16 = vadd.s32 (!%p248_p2), 64, %v310_v6 }
   0xc   : > { %v319_v17 = vadd.s32 (!%p248_p2), 72, %v310_v6  ;;  %v3063_v18 = vadd.s32 (!%p248_p2), 80, %v310_v6  ;;  %v3065_v19 = vadd.s32 (!%p248_p2), 88, %v310_v6 }
   0xd   : > { %s3993_s25 = smov (!%p3009_p3, %s2275_s25), 1  ;;  %v3072_v20 = vmul.u32.u64.low 2863311531, %v310_v6  ;;  %v3073_v21 = vmul.u32.u64.high 2863311531, %v310_v6, %v3072_v20  ;;  %v3075_v22 = vmul.u32.u64.low 2863311531, %v311_v9  ;;  %v3076_v23 = vmul.u32.u64.high 2863311531, %v311_v9, %v3075_v22 }
   0xe   : > { %s2873_s16 = smul.u32 192, %s3993_s25  ;;  %v3078_v24 = vmul.u32.u64.low 2863311531, %v312_v10  ;;  %v3079_v25 = vmul.u32.u64.high 2863311531, %v312_v10, %v3078_v24  ;;  %v3081_v26 = vmul.u32.u64.low 2863311531, %v313_v11  ;;  %v3082_v27 = vmul.u32.u64.high 2863311531, %v313_v11, %v3081_v26 }
   0xf   : > { %s2874_s17 = smul.u32 384, %s3993_s25  ;;  %v3084_v28 = vmul.u32.u64.low 2863311531, %v314_v12  ;;  %v3085_v29 = vmul.u32.u64.high 2863311531, %v314_v12, %v3084_v28  ;;  %v3087_v30 = vmul.u32.u64.low 2863311531, %v315_v13  ;;  %v3088_v31 = vmul.u32.u64.high 2863311531, %v315_v13, %v3087_v30 }
  0x10   : > { %s3056_s20 = scalar_lea.vmem %s3860_s0, %s2873_s16  ;;  %s3061_s23 = scalar_lea.vmem %s3861_s1, %s2873_s16  ;;  %v3090_v32 = vmul.u32.u64.low 2863311531, %v316_v14  ;;  %v3091_v33 = vmul.u32.u64.high 2863311531, %v316_v14, %v3090_v32  ;;  %v3093_v34 = vmul.u32.u64.low 2863311531, %v317_v15  ;;  %v3094_v35 = vmul.u32.u64.high 2863311531, %v317_v15, %v3093_v34 }
  0x11   : > { %s3070_s27 = scalar_lea.vmem %s3867_s7, %s2874_s17  ;;  %v328_v36 = vshrl.u32 %v3073_v21, 4  ;;  %v339_v37 = vshrl.u32 %v3076_v23, 4  ;;  %v3098_v38 = vmul.u32.u64.low 2863311531, %v318_v16  ;;  %v3099_v39 = vmul.u32.u64.high 2863311531, %v318_v16, %v3098_v38 }
  0x12   : > { %v350_v40 = vshrl.u32 %v3079_v25, 4  ;;  %v361_v41 = vshrl.u32 %v3082_v27, 4  ;;  %v3103_v42 = vmul.u32.u64.low 2863311531, %v319_v17  ;;  %v3104_v43 = vmul.u32.u64.high 2863311531, %v319_v17, %v3103_v42 }
  0x13   : > { %v329_v44 = vmul.u32 24, %v328_v36  ;;  %v340_v45 = vmul.u32 24, %v339_v37  ;;  %v372_v46 = vshrl.u32 %v3085_v29, 4  ;;  %v383_v47 = vshrl.u32 %v3088_v31, 4 }
  0x14   : > { %v351_v48 = vmul.u32 24, %v350_v40  ;;  %v362_v49 = vmul.u32 24, %v361_v41  ;;  %v394_v50 = vshrl.u32 %v3091_v33, 4  ;;  %v405_v51 = vshrl.u32 %v3094_v35, 4 }
  0x15   : > { %v3110_v52 = vsub.s32 %v310_v6, %v329_v44  ;;  %v3112_v53 = vsub.s32 %v311_v9, %v340_v45  ;;  %v373_v54 = vmul.u32 24, %v372_v46  ;;  %v384_v55 = vmul.u32 24, %v383_v47 }
  0x16   : > { %v3114_v56 = vsub.s32 %v312_v10, %v351_v48  ;;  %v3116_v57 = vsub.s32 %v313_v11, %v362_v49  ;;  %v395_v58 = vmul.u32 24, %v394_v50  ;;  %v406_v59 = vmul.u32 24, %v405_v51 }
  0x17   : > { %v3118_v60 = vsub.s32 %v314_v12, %v373_v54  ;;  %v3120_v61 = vsub.s32 %v315_v13, %v384_v55  ;;  %v416_v62 = vshrl.u32 %v3099_v39, 4  ;;  %v427_v63 = vshrl.u32 %v3104_v43, 4 }
  0x18   : > { %v3124_v0 = vsub.s32 %v316_v14, %v395_v58  ;;  %v3126_v2 = vsub.s32 %v317_v15, %v406_v59  ;;  %v3129_v6 = vmul.u32.u64.low 2863311531, %v3063_v18  ;;  %v3130_v9 = vmul.u32.u64.high 2863311531, %v3063_v18, %v3129_v6 }
  0x19   : > { %v417_v10 = vmul.u32 24, %v416_v62  ;;  %v428_v11 = vmul.u32 24, %v427_v63  ;;  %vm454_vm1 = vcmp.ne.s32.totalorder %v3110_v52, 0  ;;  %vm455_vm2 = vcmp.ne.s32.totalorder %v3112_v53, 0 }
  0x1a   : > { %v3135_v12 = vmul.u32.u64.low 2863311531, %v3065_v19  ;;  %v3136_v13 = vmul.u32.u64.high 2863311531, %v3065_v19, %v3135_v12  ;;  %vm456_vm3 = vcmp.ne.s32.totalorder %v3114_v56, 0  ;;  %vm457_vm4 = vcmp.ne.s32.totalorder %v3116_v57, 0 }
  0x1b   : > { %v3140_v14 = vsub.s32 %v318_v16, %v417_v10  ;;  %v3142_v15 = vsub.s32 %v319_v17, %v428_v11  ;;  %vm458_vm5 = vcmp.ne.s32.totalorder %v3118_v60, 0  ;;  %vm459_vm6 = vcmp.ne.s32.totalorder %v3120_v61, 0 }
  0x1c   : > { %v438_v20 = vshrl.u32 %v3130_v9, 4  ;;  %vm466_vm9 = vcmp.lt.s32.totalorder %v3110_v52, 0  ;;  %vm467_vm12 = vcmp.lt.s32.totalorder %v3112_v53, 0  ;;  %vm468_vm13 = vcmp.lt.s32.totalorder %v3114_v56, 0 }
  0x1d   : > { %vm3156_vm14 = vmand %vm466_vm9, %vm454_vm1  ;;  %v449_v21 = vshrl.u32 %v3136_v13, 4  ;;  %vm469_vm15 = vcmp.lt.s32.totalorder %v3116_v57, 0  ;;  %vm470_vm0 = vcmp.lt.s32.totalorder %v3118_v60, 0  ;;  %vm471_vm10 = vcmp.lt.s32.totalorder %v3120_v61, 0 }
  0x1e   : > { %v439_v17 = vmul.u32 24, %v438_v20  ;;  %vm3165_vm11 = vmand %vm467_vm12, %vm455_vm2  ;;  %vm472_vm1 = vcmp.lt.s32.totalorder %v3124_v0, 0  ;;  %vm473_vm9 = vcmp.lt.s32.totalorder %v3126_v2, 0  ;;  %vm475_vm2 = vcmp.lt.s32.totalorder %v3142_v15, 0 }
  0x1f   : > { %vm3175_vm7 = vmand %vm468_vm13, %vm456_vm3  ;;  %v450_v25 = vmul.u32 24, %v449_v21  ;;  %v490_v27 = vadd.s32 24, %v3110_v52  ;;  %v491_v29 = vadd.s32 24, %v3112_v53  ;;  %v493_v30 = vadd.s32 24, %v3116_v57 }
  0x20   : > { %v440_v24 = vsub.s32 %v3063_v18, %v439_v17  ;;  %vm3183_vm12 = vmand %vm469_vm15, %vm457_vm4  ;;  %v492_v18 = vadd.s32 24, %v3114_v56  ;;  %v494_v31 = vadd.s32 24, %v3118_v60  ;;  %v495_v34 = vadd.s32 24, %v3120_v61 }
  0x21   : > { %vm3190_vm8 = vmand %vm470_vm0, %vm458_vm5  ;;  %v451_v32 = vsub.s32 %v3065_v19, %v450_v25  ;;  %vm3883_vm5 = vcmp.ne.s32.totalorder %v3124_v0, 0  ;;  %v496_v19 = vadd.s32 24, %v3124_v0  ;;  %v497_v36 = vadd.s32 24, %v3126_v2 }
  0x22   : > { %vm3203_vm0 = vmand %vm471_vm10, %vm459_vm6  ;;  %v498_v37 = vadd.s32 24, %v3140_v14  ;;  %v499_v38 = vadd.s32 24, %v3142_v15  ;;  %vm3886_vm15 = vcmp.ne.s32.totalorder %v3126_v2, 0  ;;  %v500_v40 = vadd.s32 24, %v440_v24 }
  0x23   : > { %vm3212_vm13 = vmand %vm472_vm1, %vm3883_vm5  ;;  %vm465_vm6 = vcmp.ne.s32.totalorder %v451_v32, 0  ;;  %vm477_vm10 = vcmp.lt.s32.totalorder %v451_v32, 0  ;;  %v501_v41 = vadd.s32 24, %v451_v32  ;;  %vm3889_vm1 = vcmp.ne.s32.totalorder %v3140_v14, 0 }
  0x24   : > { %vm3224_vm4 = vmand %vm473_vm9, %vm3886_vm15  ;;  %vm3890_vm5 = vcmp.lt.s32.totalorder %v3140_v14, 0  ;;  %v502_v43 = vsel %vm3156_vm14, %v490_v27, %v3110_v52  ;;  %v503_v44 = vsel %vm3165_vm11, %v491_v29, %v3112_v53  ;;  %v504_v45 = vsel %vm3175_vm7, %v492_v18, %v3114_v56 }
  0x25   : > { %vm3232_vm3 = vmand %vm3890_vm5, %vm3889_vm1  ;;  %v505_v46 = vsel %vm3183_vm12, %v493_v30, %v3116_v57  ;;  %vm3893_vm9 = vcmp.ne.s32.totalorder %v3142_v15, 0  ;;  %v506_v48 = vsel %vm3190_vm8, %v494_v31, %v3118_v60  ;;  %v507_v49 = vsel %vm3203_vm0, %v495_v34, %v3120_v61 }
  0x26   : > { %vm3252_vm15 = vmand %vm475_vm2, %vm3893_vm9  ;;  %v508_v50 = vsel %vm3212_vm13, %v496_v19, %v3124_v0  ;;  %v509_v51 = vsel %vm3224_vm4, %v497_v36, %v3126_v2  ;;  %vm3896_vm7 = vcmp.ne.s32.totalorder %v440_v24, 0  ;;  %vm3897_vm11 = vcmp.lt.s32.totalorder %v440_v24, 0 }
  0x27   : > { %vm3270_vm14 = vmand %vm3897_vm11, %vm3896_vm7  ;;  %v510_v53 = vsel %vm3232_vm3, %v498_v37, %v3140_v14  ;;  %v511_v54 = vsel %vm3252_vm15, %v499_v38, %v3142_v15  ;;  %vm3280_vm8 = vcmp.lt.s32.totalorder %v502_v43, 16  ;;  %vm3284_vm2 = vcmp.lt.s32.totalorder %v503_v44, 16 }
  0x28   : > { %vm489_vm12 = vmand %vm477_vm10, %vm465_vm6  ;;  %v512_v57 = vsel %vm3270_vm14, %v500_v40, %v440_v24  ;;  %vm3292_vm4 = vcmp.lt.s32.totalorder %v504_v45, 16  ;;  %vm3296_vm3 = vcmp.lt.s32.totalorder %v505_v46, 16  ;;  %vm3300_vm0 = vcmp.lt.s32.totalorder %v506_v48, 16 }
  0x29   : > { %v3908_v60 = vmov 0  ;;  %v513_v61 = vsel %vm489_vm12, %v501_v41, %v451_v32  ;;  %vm3304_vm13 = vcmp.lt.s32.totalorder %v507_v49, 16  ;;  %vm3308_vm6 = vcmp.lt.s32.totalorder %v508_v50, 16 }
  0x2a   : > { %v3909_v60 = vsel %vm3300_vm0, 4294967295, %v3908_v60  ;;  %vm3312_vm10 = vcmp.lt.s32.totalorder %v509_v51, 16  ;;  %vm3316_vm1 = vcmp.lt.s32.totalorder %v510_v53, 16  ;;  %vm3320_vm5 = vcmp.lt.s32.totalorder %v511_v54, 16 }
  0x2b   : > { %vm3324_vm9 = vcmp.lt.s32.totalorder %v512_v57, 16  ;;  %vm3328_vm15 = vcmp.lt.s32.totalorder %v513_v61, 16 }
  0x2c LB: >> { %v2291_v11 = vcombine.low %v3016_v1, %v3029_v3  ;;  %v2292_v12 = vcombine.low %v3034_v4, %v3039_v5  ;;  %s538_s29 = smul.u32 96, %s2954_s28  ;;  %v2293_v13 = vcombine.low %v3046_v7, %v3046_v7  ;;  %vm3869_vm7 = vcmask 1041408   ;;  %s537_s28 = sadd.s32 1, %s2954_s28   ;;  %s2954_s28 = sphi %s3332_s28, %s537_s28  }
  0x2d   : >> { %vm606_vm11 = vcmask 293888   ;;  %vm3924_vm14 = vcmask 64512   ;;  %vm3925_vm0 = vnez %v3909_v60  ;;  %p534_p4 = scmp.ge.s32.totalorder %s537_s28, 4  }
  0x2e   : >> { %2735 = vmatprep.subr.bf16.mxu1 %v2291_v11  ;;  %2577 = vmatprep.subr.bf16.mxu0 %v2291_v11  ;;  %s539_s30 = sshra.s32 %s538_s29, 3  ;;  %v627_v15 = vsel %vm3869_vm7, %v2293_v13, 0  ;;  %s3370_s10 = scalar_lea.vmem [#allocation2], %s538_s29  ;;  %vm3926_vm12 = vmmov %vm3924_vm14  ;;  %v3446_v1 = vld [vmem:[%s3864_s4 + $0x10] sm:$0xf] (%p534_p4) }
  0x2f   : >> { %2738 = vmatpush3.bf16.msra.mxu1 %v2291_v11  ;;  %2578 = vmatpush3.bf16.msra.mxu0 %v2291_v11  ;;  %s2283_s8 = sshll.u32 %s539_s30, 2  ;;  %v3451_v3 = vld [vmem:[%s3864_s4 + $0x14] sm:$0xf] (%p534_p4)  ;;  %v3456_v4 = vld [vmem:[%s3864_s4 + $0x18] sm:$0xf] (%p534_p4)  ;;  %s3478_s13 = smov (%p534_p4), 0  }
  0x30   : >> { %2736 = vmatprep.subr.bf16.mxu1 %v2292_v12  ;;  %2579 = vmatprep.subr.bf16.mxu0 %v2292_v12  ;;  %s542_s9 = scalar_lea.vmem %s3056_s20, %s2283_s8  ;;  %v3461_v5 = vld [vmem:[%s3864_s4 + $0x1c] sm:$0xf] (%p534_p4)  ;;  %v3466_v7 = vld [vmem:[%s3864_s4 + $0x20] sm:$0xf] (%p534_p4) }
  0x31   : >> { %v2924_v14 = vld [vmem:[%s542_s9 + $0x10] sm:$0xff]   ;;  %v2925_v20 = vld [vmem:[%s542_s9 + $0x18] sm:$0xff]   ;;  %v2926_v16 = vld [vmem:[%s542_s9] sm:$0xff]  }
  0x32   : >> { %2587 = vmatprep.mubr.msk.bf16.mxu1 %vm606_vm11, %v2924_v14  ;;  %v2927_v17 = vld [vmem:[%s542_s9 + $0x8] sm:$0xff]   ;;  %v2928_v21 = vld [vmem:[%s542_s9 + $0x20] sm:$0xff]   ;;  %2583 = vmatprep.mubr.msk.bf16.mxu0 %vm606_vm11, %v2926_v16 }
  0x33   : >> { %2739 = vmatpush3.bf16.msra.mxu1 %v2292_v12  ;;  %2580 = vmatpush3.bf16.msra.mxu0 %v2292_v12  ;;  %v2929_v22 = vld [vmem:[%s542_s9 + $0x28] sm:$0xff]   ;;  %v3476_v55 = vld [vmem:[%s3866_s6] sm:$0x3] (%p534_p4) }
  0x34   : >> { %2862 = vmatprep.subr.msk.bf16.mxu1 %vm3869_vm7, %v2293_v13  ;;  %2861 = vmatprep.subr.msk.bf16.mxu0 %vm3869_vm7, %v2293_v13 }
  0x37   : >> { %2740 = vmatpush3.bf16.msra.mxu1 %v627_v15  ;;  %2582 = vmatpush3.bf16.msra.mxu0 %v627_v15 }
  0x3a   : >> { %2588 = vmatmul.mubr.msk.bf16.vlgmr.msra.gmra.mrb[0].mxu1 %vm606_vm11, %v2925_v20  ;;  %2584 = vmatmul.mubr.msk.bf16.vlgmr.msra.gmra.mrb[0].mxu0 %vm606_vm11, %v2927_v17 }
  0x3b   : >> { %2591 = vmatprep.mubr.msk.bf16.mxu1 %vm606_vm11, %v2928_v21 }
  0x42   : >> { %2592 = vmatmul.mubr.msk.bf16.gmra.mrb[4].mxu1 %vm606_vm11, %v2929_v22  ;;  %vm3927_vm11 = vmmov %vm3926_vm12 }
  0x43   : >> { %vm3928_vm7 = vmmov %vm3927_vm11 }
 0x10d   : >> { %v2589_v23 = vpop.f32.mrb[0].mxu1  ;;  %v2585_v24 = vpop.f32.mrb[0].mxu0 }
 0x10e   : >> { %v688_v25 = vadd.f32 %v2589_v23, %v3051_v8  ;;  %v679_v26 = vpop.f32.mrb[1].mxu1  ;;  %v672_v27 = vadd.f32 %v2585_v24, %v3051_v8  ;;  %v663_v28 = vpop.f32.mrb[1].mxu0 }
 0x10f   : >> { %v680_v29 = vadd.f32 %v3051_v8, %v679_v26  ;;  %v2590_v18 = vpop.f32.mrb[2].mxu1  ;;  %v664_v30 = vadd.f32 %v3051_v8, %v663_v28  ;;  %v2586_v31 = vpop.f32.mrb[2].mxu0  ;;  %v3431_v26 = vld [vmem:[%s3864_s4 + $0x4] sm:$0xf] (%p534_p4)  ;;  %v3441_v28 = vld [vmem:[%s3864_s4 + $0xc] sm:$0xf] (%p534_p4) }
 0x110   : >> { %v716_v32 = vmax.f32 %v688_v25, 0.0  ;;  %v691_v33 = vadd.f32 %v2590_v18, %v3051_v8  ;;  %v682_v34 = vpop.f32.mrb[3].mxu1  ;;  %v712_v35 = vmax.f32 %v672_v27, 0.0  ;;  %v675_v19 = vadd.f32 %v2586_v31, %v3051_v8  ;;  %v666_v36 = vpop.f32.mrb[3].mxu0  ;;  %v3426_v25 = vld [vmem:[%s3864_s4] sm:$0xf] (%p534_p4) }
 0x111   : >> { %v714_v37 = vmax.f32 %v680_v29, 0.0  ;;  %v683_v38 = vadd.f32 %v3051_v8, %v682_v34  ;;  %v710_v39 = vmax.f32 %v664_v30, 0.0  ;;  %v667_v40 = vadd.f32 %v3051_v8, %v666_v36  ;;  %v3436_v27 = vld [vmem:[%s3864_s4 + $0x8] sm:$0xf] (%p534_p4) }
 0x112   : >> { %v728_v41 = vsel %vm3308_vm6, %v716_v32, 0.0  ;;  %v717_v42 = vmax.f32 %v691_v33, 0.0  ;;  %v724_v43 = vsel %vm3292_vm4, %v712_v35, 0.0  ;;  %v713_v44 = vmax.f32 %v675_v19, 0.0 }
 0x113   : >> { %2306 = vst.msk [vmem:[%s3370_s10 + $0x50] sm:$0xff] %vm3924_vm14, %v728_v41  ;;  %v726_v45 = vsel %vm3925_vm0, %v714_v37, 0.0  ;;  %v715_v46 = vmax.f32 %v683_v38, 0.0  ;;  %v722_v47 = vsel %vm3280_vm8, %v710_v39, 0.0  ;;  %v711_v48 = vmax.f32 %v667_v40, 0.0  ;;  %vm3929_vm14 = vmmov %vm3928_vm7 }
 0x114   : >> { %2302 = vst.msk [vmem:[%s3370_s10 + $0x30] sm:$0xff] %vm3926_vm12, %v724_v43  ;;  %v729_v49 = vsel %vm3312_vm10, %v717_v42, 0.0  ;;  %v725_v50 = vsel %vm3296_vm3, %v713_v44, 0.0  ;;  %vm3930_vm12 = vmmov %vm3928_vm7 }
 0x115   : >> { %2304 = vst.msk [vmem:[%s3370_s10 + $0x40] sm:$0xff] %vm3927_vm11, %v726_v45  ;;  %v727_v51 = vsel %vm3304_vm13, %v715_v46, 0.0  ;;  %v723_v52 = vsel %vm3284_vm2, %v711_v48, 0.0  ;;  %v2593_v53 = vpop.f32.mrb[4].mxu1  ;;  %vm3931_vm11 = vmmov %vm3928_vm7 }
 0x116   : >> { %2300 = vst.msk [vmem:[%s3370_s10 + $0x20] sm:$0xff] %vm3928_vm7, %v722_v47  ;;  %vm3932_vm0 = vmmov %vm3928_vm7  ;;  %v704_v54 = vadd.f32 %v2593_v53, %v3051_v8  ;;  %v695_v57 = vpop.f32.mrb[5].mxu1 }
 0x117   : >> { %2307 = vst.msk [vmem:[%s3370_s10 + $0x58] sm:$0xff] %vm3929_vm14, %v729_v49  ;;  %v696_v61 = vadd.f32 %v3051_v8, %v695_v57  ;;  %v2594_v11 = vpop.f32.mrb[6].mxu1  ;;  %vm3933_vm7 = vmmov %vm3932_vm0 }
 0x118   : >> { %2303 = vst.msk [vmem:[%s3370_s10 + $0x38] sm:$0xff] %vm3930_vm12, %v725_v50  ;;  %v720_v12 = vmax.f32 %v704_v54, 0.0  ;;  %v707_v13 = vadd.f32 %v2594_v11, %v3051_v8  ;;  %v698_v14 = vpop.f32.mrb[7].mxu1  ;;  %vm3934_vm14 = vmmov %vm3932_vm0  ;;  %536 = sbr.rel (!%p534_p4) target bundleno = 44 (0x2c), region = 116 }
 0x119   : >> { %2305 = vst.msk [vmem:[%s3370_s10 + $0x48] sm:$0xff] %vm3931_vm11, %v727_v51  ;;  %v718_v15 = vmax.f32 %v696_v61, 0.0  ;;  %v699_v20 = vadd.f32 %v3051_v8, %v698_v14  ;;  %vm3935_vm12 = vmmov %vm3932_vm0  ;;  %v3471_v8 = vld [vmem:[%s3865_s5] ss:$0 sm:$0xff] (%p534_p4) }
 0x11a   : >> { %2301 = vst.msk [vmem:[%s3370_s10 + $0x28] sm:$0xff] %vm3932_vm0, %v723_v52  ;;  %v732_v16 = vsel %vm3324_vm9, %v720_v12, 0.0  ;;  %v721_v17 = vmax.f32 %v707_v13, 0.0 }
 0x11b   : >> { %2310 = vst.msk [vmem:[%s3370_s10 + $0x70] sm:$0xff] %vm3932_vm0, %v732_v16  ;;  %v730_v21 = vsel %vm3316_vm1, %v718_v15, 0.0  ;;  %v719_v22 = vmax.f32 %v699_v20, 0.0 }
 0x11c   : >> { %2308 = vst.msk [vmem:[%s3370_s10 + $0x60] sm:$0xff] %vm3933_vm7, %v730_v21  ;;  %v733_v23 = vsel %vm3328_vm15, %v721_v17, 0.0 }
 0x11d   : >> { %2311 = vst.msk [vmem:[%s3370_s10 + $0x78] sm:$0xff] %vm3934_vm14, %v733_v23  ;;  %v731_v24 = vsel %vm3320_vm5, %v719_v22, 0.0 }
 0x11e   : >> { %2309 = vst.msk [vmem:[%s3370_s10 + $0x68] sm:$0xff] %vm3935_vm12, %v731_v24 }
 0x11f LB: >> { %vm832_vm8 = vcmask 1043456   ;;  %s3492_s14 = smul.u32 96, %s2958_s13  ;;  %vm3936_vm2 = vcmask 64512   ;;  %s772_s13 = sadd.s32 1, %s2958_s13   ;;  %s2958_s13 = sphi %s3478_s13, %s772_s13  }
 0x120   : >> { %2863 = vmatprep.subr.msk.bf16.mxu1 %vm832_vm8, %v3431_v26  ;;  %v834_v56 = vsel %vm832_vm8, %v3431_v26, 0  ;;  %2868 = vmatprep.subr.msk.bf16.mxu0 %vm832_vm8, %v3451_v3  ;;  %v1460_v58 = vsel %vm832_vm8, %v3451_v3, 0  ;;  %v936_v29 = vsel %vm832_vm8, %v3426_v25, 0  ;;  %v1594_v33 = vsel %vm832_vm8, %v3456_v4, 0  ;;  %vm3937_vm4 = vmmov %vm3936_vm2  ;;  %p769_p5 = scmp.ge.s32.totalorder %s772_s13, 4  }
 0x121   : >> { %2596 = vmatpush3.bf16.msra.mxu1 %v834_v56  ;;  %2666 = vmatpush3.bf16.msra.mxu0 %v1460_v58  ;;  %s3499_s15 = scalar_lea.vmem [#allocation2], %s3492_s14  ;;  %vm3938_vm3 = vmmov %vm3936_vm2  ;;  %s1957_s16 = sshra.s32 %s3492_s14, 3 }
 0x122   : >> { %2864 = vmatprep.subr.msk.bf16.mxu1 %vm832_vm8, %v3426_v25  ;;  %2869 = vmatprep.subr.msk.bf16.mxu0 %vm832_vm8, %v3456_v4  ;;  %vm3939_vm13 = vmmov %vm3936_vm2  ;;  %s2482_s17 = sshll.u32 %s1957_s16, 2  ;;  %s3831_s19 = scalar_lea.vmem %s3070_s27, %s3492_s14 }
 0x123   : >> { %vm3940_vm6 = vmmov %vm3936_vm2  ;;  %s3637_s18 = scalar_lea.vmem %s3061_s23, %s2482_s17 }
 0x124   : >> { %vm3941_vm10 = vmmov %vm3936_vm2 }
 0x125   : >> { %v2332_v59 = vld [vmem:[%s3499_s15 + $0x8] sm:$0xff]  ;;  %v2333_v60 = vld [vmem:[%s3499_s15 + $0x10] sm:$0xff]  ;;  %v2334_v2 = vld [vmem:[%s3499_s15 + $0x18] sm:$0xff] }
 0x126   : >> { %v3504_v62 = vld [vmem:[%s3499_s15 + $0x21] sm:$0xff]  ;;  %v808_v63 = vpack.c.bf16 %v2333_v60, %v2332_v59  ;;  %v3507_v0 = vld [vmem:[%s3499_s15 + $0x29] sm:$0xff]  ;;  %v3519_v18 = vld [vmem:[%s3499_s15 + $0x31] sm:$0xff] }
 0x127   : >> { %v3511_v6 = vld [vmem:[%s3499_s15 + $0x20] sm:$0xff]  ;;  %v1435_v9 = vpack.c.bf16 %v3507_v0, %v3504_v62  ;;  %v3525_v31 = vld [vmem:[%s3499_s15 + $0x28] sm:$0xff]  ;;  %v3533_v34 = vld [vmem:[%s3499_s15 + $0x30] sm:$0xff] }
 0x128   : >> { %v809_v10 = vpack.c.bf16 %v3511_v6, %v2334_v2  ;;  %v3522_v30 = vld [vmem:[%s3499_s15 + $0x39] sm:$0xff]  ;;  %2597 = vmatprep.mubr.msk.bf16.mxu1 %vm3936_vm2, %v808_v63  ;;  %v3536_v35 = vld [vmem:[%s3499_s15 + $0x41] sm:$0xff]  ;;  %v3539_v19 = vld [vmem:[%s3499_s15 + $0x49] sm:$0xff]  ;;  %v1301_v36 = vpack.c.bf16 %v3525_v31, %v3511_v6  ;;  %v810_v37 = vpack.c.bf16 %v3533_v34, %v3525_v31 }
 0x129   : >> { %v1436_v32 = vpack.c.bf16 %v3522_v30, %v3519_v18  ;;  %2667 = vmatprep.mubr.msk.bf16.mxu0 %vm3937_vm4, %v1435_v9  ;;  %v1437_v38 = vpack.c.bf16 %v3539_v19, %v3536_v35  ;;  %v3550_v39 = vld [vmem:[%s3499_s15 + $0x38] sm:$0xff]  ;;  %v3554_v40 = vld [vmem:[%s3499_s15 + $0x40] sm:$0xff]  ;;  %v3560_v42 = vld [vmem:[%s3499_s15 + $0x48] sm:$0xff] }
 0x12a   : >> { %2598 = vmatmul.mubr.msk.bf16.vlgmr.msra.gmra.mrb[0].mxu1 %vm3938_vm3, %v809_v10  ;;  %v3557_v41 = vld [vmem:[%s3499_s15 + $0x51] sm:$0xff]  ;;  %v1302_v43 = vpack.c.bf16 %v3550_v39, %v3533_v34  ;;  %v3566_v44 = vld [vmem:[%s3499_s15 + $0x59] sm:$0xff]  ;;  %v3578_v48 = vld [vmem:[%s3499_s15 + $0x61] sm:$0xff]  ;;  %v3592_v52 = vpack.c.bf16 %v3554_v40, %v3550_v39 }
 0x12b   : >> { %2610 = vmatpush3.bf16.msra.mxu1 %v936_v29  ;;  %2668 = vmatmul.mubr.msk.bf16.vlgmr.msra.gmra.mrb[0].mxu0 %vm3939_vm13, %v1436_v32  ;;  %v3569_v45 = vld [vmem:[%s3499_s15 + $0x50] sm:$0xff]  ;;  %v3572_v46 = vld [vmem:[%s3499_s15 + $0x58] sm:$0xff]  ;;  %v1438_v54 = vpack.c.bf16 %v3566_v44, %v3557_v41  ;;  %vm3942_vm1 = vmmov %vm3936_vm2 }
 0x12c   : >> { %2680 = vmatpush3.bf16.msra.mxu0 %v1594_v33  ;;  %2601 = vmatprep.mubr.msk.bf16.mxu1 %vm3940_vm6, %v810_v37  ;;  %v3581_v49 = vld [vmem:[%s3499_s15 + $0x69] sm:$0xff]  ;;  %v3584_v50 = vld [vmem:[%s3499_s15 + $0x71] sm:$0xff]  ;;  %v3602_v57 = vpack.c.bf16 %v3569_v45, %v3560_v42  ;;  %vm3943_vm5 = vmmov %vm3942_vm1  ;;  %v1058_v33 = vsel %vm832_vm8, %v3436_v27, 0 }
 0x12d   : >> { %2671 = vmatprep.mubr.msk.bf16.mxu0 %vm3941_vm10, %v1437_v38  ;;  %2865 = vmatprep.subr.msk.bf16.mxu1 %vm832_vm8, %v3436_v27  ;;  %v1840_v53 = vpack.c.bf16 %v3584_v50, %v3581_v49  ;;  %v1439_v61 = vpack.c.bf16 %v3581_v49, %v3578_v48  ;;  %vm3944_vm9 = vmmov %vm3942_vm1  ;;  %v3613_v11 = vld [vmem:[%s3499_s15 + $0x60] sm:$0xff]  ;;  %v2321_v14 = vld [vmem:[%s3499_s15 + $0xf] sm:$0xff]  ;;  %v1728_v38 = vsel %vm832_vm8, %v3461_v5, 0 }
 0x12e   : >> { %2870 = vmatprep.subr.msk.bf16.mxu0 %vm832_vm8, %v3461_v5  ;;  %vm3945_vm15 = vmmov %vm3942_vm1  ;;  %v3617_v12 = vld [vmem:[%s3499_s15 + $0x79] sm:$0xff]  ;;  %v2320_v13 = vld [vmem:[%s3499_s15 + $0x7] sm:$0xff]  ;;  %v3629_v16 = vpack.c.bf16 %v3613_v11, %v3572_v46 }
 0x12f   : >> { %v3622_v15 = vld [vmem:[%s3499_s15 + $0x37] sm:$0xff]  ;;  %v3625_v20 = vld [vmem:[%s3499_s15 + $0x3f] sm:$0xff]  ;;  %v1440_v17 = vpack.c.bf16 %v3617_v12, %v3584_v50  ;;  %v788_v21 = vpack.c.bf16 %v2321_v14, %v2320_v13  ;;  %vm3946_vm11 = vmmov %vm3942_vm1 }
 0x130   : >> { %v3634_v22 = vld [vmem:[%s3499_s15 + $0x81] sm:$0xff]  ;;  %v1569_v23 = vpack.c.bf16 %v3625_v20, %v3622_v15  ;;  %v2322_v56 = vld [vmem:[%s3499_s15 + $0x17] sm:$0xff]  ;;  %vm3947_vm0 = vmmov %vm3942_vm1 }
 0x131   : >> { %v1841_v24 = vpack.c.bf16 %v3634_v22, %v3617_v12  ;;  %v3645_v58 = vld [vmem:[%s3499_s15 + $0x1f] sm:$0xff]  ;;  %v3650_v59 = vld [vmem:[%s3499_s15 + $0x47] sm:$0xff]  ;;  %vm3948_vm7 = vmmov %vm3947_vm0  ;;  %v3988_v12 = vpack.c.bf16 %v3572_v46, %v3569_v45 }
 0x132   : >> { %2602 = vmatmul.mubr.msk.bf16.gmra.mrb[4].mxu1 %vm3942_vm1, %v3592_v52  ;;  %v3655_v60 = vld [vmem:[%s3499_s15 + $0x4f] sm:$0xff]  ;;  %vm3949_vm14 = vmmov %vm3947_vm0  ;;  %v3659_v63 = vld [vmem:[%s3499_s15 + $0x27] sm:$0xff]  ;;  %v789_v9 = vpack.c.bf16 %v3645_v58, %v2322_v56 }
 0x133   : >> { %2672 = vmatmul.mubr.msk.bf16.gmra.mrb[4].mxu0 %vm3943_vm5, %v1438_v54  ;;  %2605 = vmatprep.mubr.msk.bf16.mxu1 %vm3944_vm9, %v3602_v57  ;;  %v3662_v2 = vld [vmem:[%s3499_s15 + $0x2f] sm:$0xff]  ;;  %v3666_v10 = vld [vmem:[%s3499_s15 + $0x57] sm:$0xff]  ;;  %v3669_v29 = vld [vmem:[%s3499_s15 + $0x5f] sm:$0xff]  ;;  %v1570_v32 = vpack.c.bf16 %v3655_v60, %v3650_v59 }
 0x134   : >> { %2675 = vmatprep.mubr.msk.bf16.mxu0 %vm3945_vm15, %v1439_v61  ;;  %v790_v37 = vpack.c.bf16 %v3662_v2, %v3659_v63  ;;  %v1571_v54 = vpack.c.bf16 %v3669_v29, %v3666_v10  ;;  %vm3950_vm12 = vmmov %vm3947_vm0  ;;  %v3685_v61 = vld [vmem:[%s3499_s15 + $0x67] sm:$0xff]  ;;  %v3688_v13 = vld [vmem:[%s3499_s15 + $0x6f] sm:$0xff] }
 0x135   : >> { %vm3951_vm2 = vmmov %vm3947_vm0  ;;  %v3692_v14 = vld [vmem:[%s3499_s15 + $0x77] sm:$0xff]  ;;  %v2931_v49 = vld [vmem:[%s3637_s18 + $0x8] sm:$0xff]  }
 0x136   : >> { %vm3952_vm4 = vmmov %vm3947_vm0  ;;  %v2932_v50 = vld [vmem:[%s3637_s18 + $0x10] sm:$0xff]   ;;  %v2933_v6 = vld [vmem:[%s3637_s18 + $0x18] sm:$0xff]  }
 0x137   : >> { %vm3953_vm3 = vmmov %vm3947_vm0  ;;  %v2935_v39 = vld [vmem:[%s3637_s18 + $0x28] sm:$0xff]  }
 0x138   : >> { %vm3954_vm13 = vmmov %vm3947_vm0 }
 0x139   : >> { %vm3955_vm6 = vmmov %vm3947_vm0 }
 0x13a   : >> { %2606 = vmatmul.mubr.msk.bf16.gmra.mrb[8].mxu1 %vm3946_vm11, %v3629_v16  ;;  %vm3956_vm10 = vmmov %vm3947_vm0 }
 0x13b   : >> { %2676 = vmatmul.mubr.msk.bf16.gmra.mrb[8].mxu0 %vm3947_vm0, %v1440_v17  ;;  %2611 = vmatprep.mubr.msk.bf16.mxu1 %vm3948_vm7, %v788_v21  ;;  %v2437_v17 = vld [vmem:[%s3499_s15 + $0x7f] sm:$0xff]  ;;  %v1572_v21 = vpack.c.bf16 %v3688_v13, %v3685_v61  ;;  %vm3957_vm1 = vmmov %vm3947_vm0 }
 0x13c   : >> { %2681 = vmatprep.mubr.msk.bf16.mxu0 %vm3949_vm14, %v1569_v23  ;;  %v1573_v56 = vpack.c.bf16 %v2437_v17, %v3692_v14  ;;  %vm3958_vm5 = vmmov %vm3947_vm0  ;;  %v1192_v17 = vsel %vm832_vm8, %v3441_v28, 0 }
 0x13d   : >> { %vm3959_vm9 = vmmov %vm3947_vm0 }
 0x13e   : >> { %vm3960_vm15 = vmmov %vm3947_vm0 }
 0x13f   : >> { %vm3961_vm11 = vmmov %vm3947_vm0 }
 0x140   : >> { %vm3962_vm7 = vmmov %vm3947_vm0 }
 0x141   : >> { %vm3963_vm14 = vmmov %vm3947_vm0 }
 0x142   : >> { %2612 = vmatmul.mubr.msk.bf16.vlgmr.msra.gmra.mrb[0].mxu1 %vm3950_vm12, %v789_v9  ;;  %v2438_v9 = vld [vmem:[%s3499_s15 + $0x87] sm:$0xff]  ;;  %vm3964_vm12 = vmmov %vm3947_vm0 }
 0x143   : >> { %2624 = vmatpush3.bf16.msra.mxu1 %v1058_v33  ;;  %2682 = vmatmul.mubr.msk.bf16.vlgmr.msra.gmra.mrb[0].mxu0 %vm3951_vm2, %v1570_v32  ;;  %v2439_v33 = vld [vmem:[%s3499_s15 + $0x8f] sm:$0xff]  ;;  %vm3965_vm2 = vcmask 1041408  }
 0x144   : >> { %2694 = vmatpush3.bf16.msra.mxu0 %v1728_v38  ;;  %2615 = vmatprep.mubr.msk.bf16.mxu1 %vm3952_vm4, %v790_v37  ;;  %v2356_v37 = vld [vmem:[%s3499_s15 + $0x9] sm:$0xff]  ;;  %v2357_v38 = vld [vmem:[%s3499_s15 + $0x11] sm:$0xff]  ;;  %v1574_v51 = vpack.c.bf16 %v2439_v33, %v2438_v9  ;;  %vm3966_vm4 = vmmov %vm3947_vm0  ;;  %v1167_v33 = vpack.c.bf16 %v3659_v63, %v3645_v58 }
 0x145   : >> { %2685 = vmatprep.mubr.msk.bf16.mxu0 %vm3953_vm3, %v1571_v54  ;;  %2866 = vmatprep.subr.msk.bf16.mxu1 %vm832_vm8, %v3441_v28  ;;  %v1033_v47 = vpack.c.bf16 %v2357_v38, %v2356_v37  ;;  %vm3967_vm3 = vmmov %vm3947_vm0  ;;  %v2474_v58 = vld [vmem:[%s3499_s15 + $0x89] sm:$0xff] }
 0x146   : >> { %2871 = vmatprep.subr.msk.bf16.mxu0 %vm832_vm8, %v3466_v7 }
 0x14a   : >> { %2616 = vmatmul.mubr.msk.bf16.gmra.mrb[4].mxu1 %vm3954_vm13, %v1569_v23  ;;  %v2358_v23 = vld [vmem:[%s3499_s15 + $0x19] sm:$0xff]  ;;  %vm3968_vm13 = vmmov %vm3947_vm0 }
 0x14b   : >> { %2686 = vmatmul.mubr.msk.bf16.gmra.mrb[4].mxu0 %vm3955_vm6, %v1572_v21  ;;  %2619 = vmatprep.mubr.msk.bf16.mxu1 %vm3956_vm10, %v1570_v32  ;;  %v1034_v32 = vpack.c.bf16 %v3504_v62, %v2358_v23  ;;  %v1035_v21 = vpack.c.bf16 %v3519_v18, %v3507_v0  ;;  %v2452_v62 = vld [vmem:[%s3499_s15 + $0x68] sm:$0xff]  ;;  %v3734_v0 = vld [vmem:[%s3499_s15 + $0x78] sm:$0xff]  ;;  %v2455_v18 = vld [vmem:[%s3499_s15 + $0x80] sm:$0xff] }
 0x14c   : >> { %2689 = vmatprep.mubr.msk.bf16.mxu0 %vm3957_vm1, %v1573_v56  ;;  %v1707_v56 = vpack.c.bf16 %v2455_v18, %v3734_v0  ;;  %vm3969_vm6 = vmmov %vm3947_vm0  ;;  %v1305_v31 = vpack.c.bf16 %v2452_v62, %v3613_v11 }
 0x14d   : >> { %vm3970_vm10 = vmmov %vm3947_vm0 }
 0x14e   : >> { %vm3971_vm1 = vmmov %vm3947_vm0 }
 0x152   : >> { %2620 = vmatmul.mubr.msk.bf16.gmra.mrb[8].mxu1 %vm3958_vm5, %v1571_v54  ;;  %v1862_v54 = vsel %vm832_vm8, %v3466_v7, 0  ;;  %vm3972_vm5 = vmmov %vm3947_vm0 }
 0x153   : >> { %2690 = vmatmul.mubr.msk.bf16.gmra.mrb[8].mxu0 %vm3959_vm9, %v1574_v51  ;;  %2625 = vmatprep.mubr.msk.bf16.mxu1 %vm3960_vm15, %v1033_v47  ;;  %v3729_v47 = vld [vmem:[%s3499_s15 + $0x70] sm:$0xff]  ;;  %v1036_v51 = vpack.c.bf16 %v3536_v35, %v3522_v30  ;;  %v1038_v35 = vpack.c.bf16 %v3578_v48, %v3566_v44  ;;  %vm3973_vm9 = vmmov %vm3947_vm0  ;;  %v1169_v44 = vpack.c.bf16 %v3650_v59, %v3625_v20 }
 0x154   : >> { %2695 = vmatprep.mubr.msk.bf16.mxu0 %vm3961_vm11, %v3592_v52  ;;  %v1706_v52 = vpack.c.bf16 %v3729_v47, %v2452_v62  ;;  %v2457_v30 = vld [vmem:[%s3499_s15 + $0x90] sm:$0xff]  ;;  %vm3974_vm15 = vmmov %vm3965_vm2  ;;  %v1171_v20 = vpack.c.bf16 %v3685_v61, %v3669_v29  ;;  %v1306_v34 = vpack.c.bf16 %v3734_v0, %v3729_v47 }
 0x155   : >> { %v2024_v48 = vsel %vm3974_vm15, %v3476_v55, 0  ;;  %vm3975_vm11 = vmmov %vm3947_vm0  ;;  %v2475_v59 = vld [vmem:[%s3499_s15 + $0x91] sm:$0xff] }
 0x156   : >> { %v1842_v63 = vpack.c.bf16 %v2475_v59, %v2474_v58  ;;  %vm3990_vm15 = vmmov %vm3947_vm0 }
 0x15a   : >> { %2626 = vmatmul.mubr.msk.bf16.vlgmr.msra.gmra.mrb[0].mxu1 %vm3947_vm0, %v1034_v32 }
 0x15b   : >> { %2638 = vmatpush3.bf16.msra.mxu1 %v1192_v17  ;;  %2696 = vmatmul.mubr.msk.bf16.vlgmr.msra.gmra.mrb[0].mxu0 %vm3962_vm7, %v3602_v57  ;;  %v1037_v57 = vpack.c.bf16 %v3557_v41, %v3539_v19  ;;  %v1168_v19 = vpack.c.bf16 %v3622_v15, %v3662_v2  ;;  %v1326_v41 = vsel %vm832_vm8, %v3446_v1, 0  ;;  %vm3976_vm7 = vmmov %vm3947_vm0  ;;  %v1170_v15 = vpack.c.bf16 %v3666_v10, %v3655_v60  ;;  %v2930_v2 = vld [vmem:[%s3637_s18] sm:$0xff]  }
 0x15c   : >> { %2708 = vmatpush3.bf16.msra.mxu0 %v1862_v54  ;;  %2629 = vmatprep.mubr.msk.bf16.mxu1 %vm3963_vm14, %v1035_v21  ;;  %vm3977_vm14 = vmmov %vm3947_vm0  ;;  %v1172_v60 = vpack.c.bf16 %v3692_v14, %v3688_v13 }
 0x15d   : >> { %2699 = vmatprep.mubr.msk.bf16.mxu0 %vm3964_vm12, %v3629_v16  ;;  %2867 = vmatprep.subr.msk.bf16.mxu1 %vm832_vm8, %v3446_v1  ;;  %v2456_v16 = vld [vmem:[%s3499_s15 + $0x88] sm:$0xff]  ;;  %vm3978_vm8 = vmmov %vm3947_vm0 }
 0x15e   : >> { %2872 = vmatprep.subr.msk.bf16.mxu0 %vm3965_vm2, %v3476_v55  ;;  %v1708_v9 = vpack.c.bf16 %v2457_v30, %v2456_v16  ;;  %vm3979_vm12 = vmmov %vm3947_vm0 }
 0x15f   : >> { %vm3980_vm2 = vmmov %vm3947_vm0 }
 0x162   : >> { %2630 = vmatmul.mubr.msk.bf16.gmra.mrb[4].mxu1 %vm3966_vm4, %v1036_v51  ;;  %vm3981_vm4 = vmmov %vm3947_vm0 }
 0x163   : >> { %2700 = vmatmul.mubr.msk.bf16.gmra.mrb[4].mxu0 %vm3967_vm3, %v1706_v52  ;;  %2633 = vmatprep.mubr.msk.bf16.mxu1 %vm3968_vm13, %v1037_v57  ;;  %vm2003_vm3 = vcmask 31744   ;;  %vm3982_vm13 = vmmov %vm3947_vm0 }
 0x164   : >> { %2703 = vmatprep.mubr.msk.bf16.mxu0 %vm3969_vm6, %v1707_v56  ;;  %vm3983_vm6 = vmmov %vm3947_vm0 }
 0x16a   : >> { %2634 = vmatmul.mubr.msk.bf16.gmra.mrb[8].mxu1 %vm3970_vm10, %v1038_v35  ;;  %vm3984_vm10 = vmmov %vm3947_vm0 }
 0x16b   : >> { %2704 = vmatmul.mubr.msk.bf16.gmra.mrb[8].mxu0 %vm3971_vm1, %v1708_v9  ;;  %2639 = vmatprep.mubr.msk.bf16.mxu1 %vm3972_vm5, %v1167_v33  ;;  %vm3985_vm1 = vmmov %vm3947_vm0 }
 0x16c   : >> { %2709 = vmatprep.mubr.msk.bf16.mxu0 %vm3973_vm9, %v1036_v51  ;;  %vm3987_vm5 = vmmov %vm3947_vm0 }
 0x16d   : >> { %vm3989_vm9 = vmmov %vm3947_vm0 }
 0x172   : >> { %2640 = vmatmul.mubr.msk.bf16.vlgmr.msra.gmra.mrb[0].mxu1 %vm3975_vm11, %v1168_v19  ;;  %vm3991_vm11 = vmmov %vm3947_vm0 }
 0x173   : >> { %2652 = vmatpush3.bf16.msra.mxu1 %v1326_v41  ;;  %2710 = vmatmul.mubr.msk.bf16.vlgmr.msra.gmra.mrb[0].mxu0 %vm3947_vm0, %v1037_v57 }
 0x174   : >> { %2722 = vmatpush3.bf16.msra.mxu0 %v2024_v48  ;;  %2643 = vmatprep.mubr.msk.bf16.mxu1 %vm3976_vm7, %v1169_v44 }
 0x175   : >> { %2713 = vmatprep.mubr.msk.bf16.mxu0 %vm3977_vm14, %v1038_v35 }
 0x17a   : >> { %2644 = vmatmul.mubr.msk.bf16.gmra.mrb[4].mxu1 %vm3978_vm8, %v1170_v15 }
 0x17b   : >> { %2714 = vmatmul.mubr.msk.bf16.gmra.mrb[4].mxu0 %vm3979_vm12, %v1840_v53  ;;  %2647 = vmatprep.mubr.msk.bf16.mxu1 %vm3980_vm2, %v1171_v20  ;;  %v3986_v53 = vpack.c.bf16 %v3560_v42, %v3554_v40 }
 0x17c   : >> { %2717 = vmatprep.mubr.msk.bf16.mxu0 %vm3981_vm4, %v1841_v24 }
 0x182   : >> { %2648 = vmatmul.mubr.msk.bf16.gmra.mrb[8].mxu1 %vm3982_vm13, %v1172_v60 }
 0x183   : >> { %2718 = vmatmul.mubr.msk.bf16.gmra.mrb[8].mxu0 %vm3983_vm6, %v1842_v63  ;;  %2653 = vmatprep.mubr.msk.bf16.mxu1 %vm3984_vm10, %v1301_v36  ;;  %v2934_v36 = vld [vmem:[%s3637_s18 + $0x20] sm:$0xff]  }
 0x184   : >> { %2723 = vmatprep.mubr.msk.bf16.mxu0 %vm2003_vm3, %v2930_v2 }
 0x18a   : >> { %2654 = vmatmul.mubr.msk.bf16.vlgmr.msra.gmra.mrb[0].mxu1 %vm3985_vm1, %v1302_v43 }
 0x18b   : >> { %2724 = vmatmul.mubr.msk.bf16.vlgmr.msra.gmra.mrb[0].mxu0 %vm2003_vm3, %v2931_v49  ;;  %2657 = vmatprep.mubr.msk.bf16.mxu1 %vm3987_vm5, %v3986_v53 }
 0x18c   : >> { %2727 = vmatprep.mubr.msk.bf16.mxu0 %vm2003_vm3, %v2932_v50 }
 0x192   : >> { %2658 = vmatmul.mubr.msk.bf16.gmra.mrb[4].mxu1 %vm3989_vm9, %v3988_v12 }
 0x193   : >> { %2728 = vmatmul.mubr.msk.bf16.gmra.mrb[4].mxu0 %vm2003_vm3, %v2933_v6  ;;  %2661 = vmatprep.mubr.msk.bf16.mxu1 %vm3990_vm15, %v1305_v31 }
 0x194   : >> { %2731 = vmatprep.mubr.msk.bf16.mxu0 %vm2003_vm3, %v2934_v36 }
 0x19a   : >> { %2662 = vmatmul.mubr.msk.bf16.gmra.mrb[8].mxu1 %vm3991_vm11, %v1306_v34 }
 0x19b   : >> { %2732 = vmatmul.mubr.msk.bf16.gmra.mrb[8].mxu0 %vm2003_vm3, %v2935_v39 }
 0x25d   : >> { %v2655_v40 = vpop.f32.mrb[0].mxu1 }
 0x25e   : >> { %v2741_v42 = vadd.f32 %v2655_v40, %v3471_v8  ;;  %v2725_v43 = vpop.f32.mrb[0].mxu0  ;;  %v1362_v45 = vpop.f32.mrb[1].mxu1 }
 0x25f   : >> { %v2743_v46 = vadd.f32 %v3471_v8, %v1362_v45  ;;  %v2060_v11 = vpop.f32.mrb[1].mxu0  ;;  %v2656_v22 = vpop.f32.mrb[2].mxu1 }
 0x260   : >> { %v2742_v24 = vadd.f32 %v2741_v42, %v2725_v43  ;;  %v2745_v10 = vadd.f32 %v2656_v22, %v3471_v8  ;;  %v2726_v29 = vpop.f32.mrb[2].mxu0  ;;  %v1365_v61 = vpop.f32.mrb[3].mxu1 }
 0x261   : >> { %v2744_v13 = vadd.f32 %v2743_v46, %v2060_v11  ;;  %v2747_v14 = vadd.f32 %v3471_v8, %v1365_v61  ;;  %v2063_v37 = vpop.f32.mrb[3].mxu0 }
 0x262   : >> { %v2139_v38 = vmax.f32 %v2742_v24, 0.0  ;;  %v2746_v23 = vadd.f32 %v2745_v10, %v2726_v29 }
 0x263   : >> { %v2137_v32 = vmax.f32 %v2744_v13, 0.0  ;;  %v2748_v17 = vadd.f32 %v2747_v14, %v2063_v37 }
 0x264   : >> { %2152 = vst [vmem:[%s3831_s19 + $0x10] sm:$0xff] %v2139_v38  ;;  %v2140_v21 = vmax.f32 %v2746_v23, 0.0 }
 0x265   : >> { %2150 = vst [vmem:[%s3831_s19] sm:$0xff] %v2137_v32  ;;  %v2138_v54 = vmax.f32 %v2748_v17, 0.0  ;;  %v2659_v62 = vpop.f32.mrb[4].mxu1 }
 0x266   : >> { %2153 = vst [vmem:[%s3831_s19 + $0x18] sm:$0xff] %v2140_v21  ;;  %v2749_v47 = vadd.f32 %v2659_v62, %v3471_v8  ;;  %v2729_v0 = vpop.f32.mrb[4].mxu0  ;;  %v1378_v18 = vpop.f32.mrb[5].mxu1 }
 0x267   : >> { %2151 = vst [vmem:[%s3831_s19 + $0x8] sm:$0xff] %v2138_v54  ;;  %v2751_v51 = vadd.f32 %v3471_v8, %v1378_v18  ;;  %v2076_v52 = vpop.f32.mrb[5].mxu0  ;;  %v2660_v57 = vpop.f32.mrb[6].mxu1 }
 0x268   : >> { %v2750_v56 = vadd.f32 %v2749_v47, %v2729_v0  ;;  %v2753_v16 = vadd.f32 %v2660_v57, %v3471_v8  ;;  %v2730_v30 = vpop.f32.mrb[6].mxu0  ;;  %v1381_v35 = vpop.f32.mrb[7].mxu1 }
 0x269   : >> { %v2752_v9 = vadd.f32 %v2751_v51, %v2076_v52  ;;  %v2755_v33 = vadd.f32 %v3471_v8, %v1381_v35  ;;  %v2079_v19 = vpop.f32.mrb[7].mxu0 }
 0x26a   : >> { %v2143_v41 = vmax.f32 %v2750_v56, 0.0  ;;  %v2754_v44 = vadd.f32 %v2753_v16, %v2730_v30 }
 0x26b   : >> { %v2141_v48 = vmax.f32 %v2752_v9, 0.0  ;;  %v2756_v15 = vadd.f32 %v2755_v33, %v2079_v19 }
 0x26c   : >> { %2156 = vst [vmem:[%s3831_s19 + $0x30] sm:$0xff] %v2143_v41  ;;  %v2144_v20 = vmax.f32 %v2754_v44, 0.0 }
 0x26d   : >> { %2154 = vst [vmem:[%s3831_s19 + $0x20] sm:$0xff] %v2141_v48  ;;  %v2142_v58 = vmax.f32 %v2756_v15, 0.0  ;;  %v2663_v59 = vpop.f32.mrb[8].mxu1 }
 0x26e   : >> { %2157 = vst [vmem:[%s3831_s19 + $0x38] sm:$0xff] %v2144_v20  ;;  %v2757_v60 = vadd.f32 %v2663_v59, %v3471_v8  ;;  %v2733_v63 = vpop.f32.mrb[8].mxu0  ;;  %v1394_v2 = vpop.f32.mrb[9].mxu1 }
 0x26f   : >> { %2155 = vst [vmem:[%s3831_s19 + $0x28] sm:$0xff] %v2142_v58  ;;  %v2759_v49 = vadd.f32 %v3471_v8, %v1394_v2  ;;  %v2092_v50 = vpop.f32.mrb[9].mxu0  ;;  %v2664_v53 = vpop.f32.mrb[10].mxu1 }
 0x270   : >> { %v2758_v6 = vadd.f32 %v2757_v60, %v2733_v63  ;;  %v2761_v31 = vadd.f32 %v2664_v53, %v3471_v8  ;;  %v2734_v36 = vpop.f32.mrb[10].mxu0  ;;  %v1397_v12 = vpop.f32.mrb[11].mxu1 }
 0x271   : >> { %v2760_v34 = vadd.f32 %v2759_v49, %v2092_v50  ;;  %v2763_v39 = vadd.f32 %v3471_v8, %v1397_v12  ;;  %v2095_v40 = vpop.f32.mrb[11].mxu0  ;;  %771 = sbr.rel (!%p769_p5) target bundleno = 287 (0x11f), region = 127 }
 0x272   : >> { %v2147_v42 = vmax.f32 %v2758_v6, 0.0  ;;  %v2762_v43 = vadd.f32 %v2761_v31, %v2734_v36 }
 0x273   : >> { %v2145_v45 = vmax.f32 %v2760_v34, 0.0  ;;  %v2764_v46 = vadd.f32 %v2763_v39, %v2095_v40 }
 0x274   : >> { %2160 = vst [vmem:[%s3831_s19 + $0x50] sm:$0xff] %v2147_v42  ;;  %v2148_v11 = vmax.f32 %v2762_v43, 0.0 }
 0x275   : >> { %2158 = vst [vmem:[%s3831_s19 + $0x40] sm:$0xff] %v2145_v45  ;;  %v2146_v22 = vmax.f32 %v2764_v46, 0.0 }
 0x276   : >> { %2161 = vst [vmem:[%s3831_s19 + $0x58] sm:$0xff] %v2148_v11 }
 0x277   : >> { %2159 = vst [vmem:[%s3831_s19 + $0x48] sm:$0xff] %v2146_v22 }
 0x278 PF: > { %s17_s24 = sadd.s32 1, %s2950_s24  }
 0x279   : > { %p14_p6 = scmp.ge.s32.totalorder %s17_s24, 4  }
 0x27b   :  { %16 = sbr.rel (!%p14_p6) target bundleno = 1 (0x1), region = 138 }

</bundles_post_ra>
